<compile_context>
chip_gen: v5e
topology: v5e:2x2
jax: 0.10.0
libtpu: 0.0.40
codegen_flags: <defaults>
</compile_context>

<pallas_src>
import jax
import jax.numpy as jnp
from jax.experimental import pallas as pl
from jax.experimental.pallas import tpu as pltpu

KSZ = 5                       # conv kernel size
IMG = 28
CONV_OUT = 24                 # 28 - 5 + 1
POOL = 3
POOL_OUT = 8                  # 24 // 3
PP = POOL_OUT * POOL_OUT      # 64 pooled positions per image
C_OUT = 20
FLAT = C_OUT * PP             # 1280 == 8*8*20 (torch NCHW flatten order)
HID = 64
NCLS = 10
NCLS_PAD = 128                # lane-dense padded logits width
NEG = -1e30                   # masks padded logit lanes out of the softmax


def _round_up(a, b):
    return (a + b - 1) // b * b


# ----------------------------- kernels ------------------------------------ #

def conv_pool_kernel(p_ref, w_ref, b_ref, o_ref):
    # p_ref: (9, 25, TB*64)   im2col patches per pool-offset d, K on sublanes
    # w_ref: (20, 25)         conv weight, channels on sublanes
    # b_ref: (20, 1)          conv bias
    # o_ref: (20, TB*64)      pooled activations, lane-dense
    w = w_ref[...]
    b = b_ref[...]
    acc = jnp.maximum(
        jnp.dot(w, p_ref[0], preferred_element_type=jnp.float32) + b, 0.0)
    for d in range(1, POOL * POOL):            # running max == 3x3/3 max-pool
        cd = jnp.maximum(
            jnp.dot(w, p_ref[d], preferred_element_type=jnp.float32) + b, 0.0)
        acc = jnp.maximum(acc, cd)
    o_ref[...] = acc


def head_kernel(x_ref, w1_ref, b1_ref, w2_ref, b2_ref, o_ref):
    # x_ref: (TB, 1280)  w1_ref: (1280, 64)  b1_ref: (1, 64)
    # w2_ref: (64, 128) zero-padded   b2_ref: (1, 128) with NEG in padded lanes
    # o_ref: (TB, 128)
    h = jnp.dot(x_ref[...], w1_ref[...], preferred_element_type=jnp.float32)
    h = jnp.maximum(h + b1_ref[...], 0.0)
    logits = jnp.dot(h, w2_ref[...], preferred_element_type=jnp.float32)
    logits = logits + b2_ref[...]              # padded lanes sit at ~NEG
    m = jnp.max(logits, axis=-1, keepdims=True)
    lse = m + jnp.log(jnp.sum(jnp.exp(logits - m), axis=-1, keepdims=True))
    o_ref[...] = logits - lse


# --------------------------- pallas wrappers ------------------------------- #

def conv_relu_pool(patches, wc_mat, bc_col, tb_conv):
    # patches: (9, 25, Np*64) -> pooled (20, Np*64)
    lanes_total = patches.shape[-1]
    lanes_blk = tb_conv * PP                   # multiple of 128 (tb_conv >= 8)
    grid = (lanes_total // lanes_blk,)
    return pl.pallas_call(
        conv_pool_kernel,
        out_shape=jax.ShapeDtypeStruct((C_OUT, lanes_total), jnp.float32),
        grid_spec=pltpu.PrefetchScalarGridSpec(
            num_scalar_prefetch=0,
            grid=grid,
            in_specs=[
                pl.BlockSpec((POOL * POOL, KSZ * KSZ, lanes_blk),
                             lambda i: (0, 0, i)),
                pl.BlockSpec((C_OUT, KSZ * KSZ), lambda i: (0, 0)),
                pl.BlockSpec((C_OUT, 1), lambda i: (0, 0)),
            ],
            out_specs=pl.BlockSpec((C_OUT, lanes_blk), lambda i: (0, i)),
        ),
        compiler_params=pltpu.CompilerParams(
            dimension_semantics=("parallel",)),
    )(patches, wc_mat, bc_col)


def head(x_flat, w1t, b1_row, w2t_pad, b2_pad, tb_head):
    # x_flat: (Np, 1280) -> (Np, 128) padded log-probs
    n_pad = x_flat.shape[0]
    return pl.pallas_call(
        head_kernel,
        out_shape=jax.ShapeDtypeStruct((n_pad, NCLS_PAD), jnp.float32),
        grid_spec=pltpu.PrefetchScalarGridSpec(
            num_scalar_prefetch=0,
            grid=(n_pad // tb_head,),
            in_specs=[
                pl.BlockSpec((tb_head, FLAT), lambda i: (i, 0)),
                pl.BlockSpec((FLAT, HID), lambda i: (0, 0)),
                pl.BlockSpec((1, HID), lambda i: (0, 0)),
                pl.BlockSpec((HID, NCLS_PAD), lambda i: (0, 0)),
                pl.BlockSpec((1, NCLS_PAD), lambda i: (0, 0)),
            ],
            out_specs=pl.BlockSpec((tb_head, NCLS_PAD), lambda i: (i, 0)),
        ),
        compiler_params=pltpu.CompilerParams(
            dimension_semantics=("parallel",)),
    )(x_flat, w1t, b1_row, w2t_pad, b2_pad)


# ------------------------------ glue (JAX) --------------------------------- #

def build_pool_patches(x):
    # x: (Np, 1, 28, 28) -> (9, 25, Np*64)
    # patches[dh*3+dw, kh*5+kw, b*64 + ph*8 + pw] = x[b, 0, 3*ph+dh+kh, 3*pw+dw+kw]
    # TODO(synk): im2col patch extraction stays as XLA glue (pure layout work).
    n = x.shape[0]
    xs = x[:, 0]
    offs = []
    for dh in range(POOL):
        for dw in range(POOL):
            taps = []
            for kh in range(KSZ):
                for kw in range(KSZ):
                    r0 = dh + kh
                    c0 = dw + kw
                    sl = xs[:, r0:r0 + POOL * (POOL_OUT - 1) + 1:POOL,
                               c0:c0 + POOL * (POOL_OUT - 1) + 1:POOL]  # (Np,8,8)
                    taps.append(sl.reshape(n * PP))
            offs.append(jnp.stack(taps, axis=0))      # (25, Np*64)
    return jnp.stack(offs, axis=0)                    # (9, 25, Np*64)


def cnn_forward(x, params):
    # x: (N, 1, 28, 28) float32, NCHW (PyTorch convention)
    wc, bc, w1, b1, w2, b2 = params
    n = x.shape[0]

    # Batch tiling: head blocks of up to 128 images (fills MXU sublanes),
    # conv blocks of up to 32 images (keeps double-buffered VMEM well under
    # every generation's default scoped limit, incl. v7x's 64 MiB VMEM).
    tb_head = min(128, _round_up(n, 8))
    n_pad = _round_up(n, tb_head)
    if n_pad % 32 == 0:
        tb_conv = 32
    elif n_pad % 16 == 0:
        tb_conv = 16
    else:
        tb_conv = 8

    x_p = jnp.pad(x.astype(jnp.float32),
                  ((0, n_pad - n), (0, 0), (0, 0), (0, 0)))

    # conv1 + bias + ReLU + max_pool2d(3,3), fused (Pallas kernel 1)
    patches = build_pool_patches(x_p)                       # (9, 25, Np*64)
    wc_mat = wc.reshape(C_OUT, KSZ * KSZ)                   # (20, 25)
    bc_col = bc.reshape(C_OUT, 1)
    pooled_t = conv_relu_pool(patches, wc_mat, bc_col, tb_conv)   # (20, Np*64)

    # (20, Np*64) -> (Np, 1280); feature index c*64 + ph*8 + pw reproduces
    # torch's x.view(-1, 8*8*20) NCHW flatten order exactly (small XLA glue).
    x_flat = pooled_t.reshape(C_OUT, n_pad, PP)
    x_flat = jnp.transpose(x_flat, (1, 0, 2)).reshape(n_pad, FLAT)

    # fc1 + ReLU + fc2 + log_softmax, batched (Pallas kernel 2)
    w1t = w1.T                                              # (1280, 64)
    b1_row = b1.reshape(1, HID)
    w2t_pad = jnp.zeros((HID, NCLS_PAD), jnp.float32).at[:, :NCLS].set(w2.T)
    b2_pad = jnp.full((1, NCLS_PAD), NEG, jnp.float32).at[0, :NCLS].set(b2)
    out_pad = head(x_flat, w1t, b1_row, w2t_pad, b2_pad, tb_head)  # (Np, 128)

    return out_pad[:n, :NCLS]


# --------------------------- pure-JAX reference ----------------------------- #

def reference_forward(x, params):
    wc, bc, w1, b1, w2, b2 = params
    hi = jax.lax.Precision.HIGHEST
    conv = jax.lax.conv_general_dilated(
        x.astype(jnp.float32), wc, window_strides=(1, 1), padding="VALID",
        dimension_numbers=("NCHW", "OIHW", "NCHW"), precision=hi)
    conv = jnp.maximum(conv + bc.reshape(1, C_OUT, 1, 1), 0.0)
    pooled = jax.lax.reduce_window(
        conv, -jnp.inf, jax.lax.max,
        (1, 1, POOL, POOL), (1, 1, POOL, POOL), "VALID")     # (N,20,8,8)
    flat = pooled.reshape(x.shape[0], FLAT)
    h = jnp.maximum(jnp.dot(flat, w1.T, precision=hi) + b1, 0.0)
    logits = jnp.dot(h, w2.T, precision=hi) + b2
    return jax.nn.log_softmax(logits, axis=-1)


# ------------------------------- main -------------------------------------- #

if __name__ == "__main__":
    key = jax.random.PRNGKey(0)
    ks = jax.random.split(key, 7)
    # deterministic synthetic parameters (torch shapes), not a checkpoint load
    wc = jax.random.normal(ks[0], (C_OUT, 1, KSZ, KSZ), jnp.float32) * 0.1
    bc = jax.random.normal(ks[1], (C_OUT,), jnp.float32) * 0.1
    w1 = jax.random.normal(ks[2], (HID, FLAT), jnp.float32) * 0.02
    b1 = jax.random.normal(ks[3], (HID,), jnp.float32) * 0.02
    w2 = jax.random.normal(ks[4], (NCLS, HID), jnp.float32) * 0.1
    b2 = jax.random.normal(ks[5], (NCLS,), jnp.float32) * 0.1
    params = (wc, bc, w1, b1, w2, b2)

    x = jax.random.normal(ks[6], (2, 1, IMG, IMG), jnp.float32)

    out = jax.jit(cnn_forward)(x, params)
    out = jax.block_until_ready(out)
    assert out.shape == (2, NCLS)

    # log_softmax rows must exponentiate-sum to ~1
    row_sums = jnp.sum(jnp.exp(out), axis=-1)
    assert bool(jnp.all(jnp.abs(row_sums - 1.0) < 1e-4))

    # match the PyTorch-module semantics (pure-JAX reference, loose f32 tol
    # to absorb MXU vs XLA matmul precision differences)
    ref = jax.jit(reference_forward)(x, params)
    ref = jax.block_until_ready(ref)
    assert bool(jnp.max(jnp.abs(out - ref)) < 3e-2)

    print("KERNEL_OK")
</pallas_src>

<mosaic_0001>
module attributes {stable_mosaic.version = 11 : i64} {
  func.func @conv_pool_kernel(%arg0: i32, %arg1: memref<9x25x512xf32, #tpu.memory_space<vmem>>, %arg2: memref<20x25xf32, #tpu.memory_space<vmem>>, %arg3: memref<20x1xf32, #tpu.memory_space<vmem>>, %arg4: memref<20x512xf32, #tpu.memory_space<vmem>>) attributes {dimension_semantics = [#tpu.dimension_semantics<parallel>], iteration_bounds = array<i64: 1>, scalar_prefetch = 0 : i64, scratch_operands = 0 : i64, tpu.core_type = #tpu.core_type<tc>, window_params = [{transform_indices = @transform_0, window_bounds = array<i64: 9, 25, 512>}, {pipeline_mode = #tpu.pipeline_mode<synchronous>, transform_indices = @transform_1, window_bounds = array<i64: 20, 25>}, {pipeline_mode = #tpu.pipeline_mode<synchronous>, transform_indices = @transform_2, window_bounds = array<i64: 20, 1>}, {transform_indices = @transform_3, window_bounds = array<i64: 20, 512>}]} {
    %c0 = arith.constant 0 : index
    %c0_0 = arith.constant 0 : index
    %0 = vector.load %arg2[%c0, %c0_0] : memref<20x25xf32, #tpu.memory_space<vmem>>, vector<20x25xf32>
    %c0_1 = arith.constant 0 : index
    %c0_2 = arith.constant 0 : index
    %1 = vector.load %arg3[%c0_1, %c0_2] : memref<20x1xf32, #tpu.memory_space<vmem>>, vector<20x1xf32>
    %c0_3 = arith.constant 0 : index
    %c0_4 = arith.constant 0 : index
    %c0_5 = arith.constant 0 : index
    %2 = vector.load %arg1[%c0_3, %c0_4, %c0_5] : memref<9x25x512xf32, #tpu.memory_space<vmem>>, vector<1x25x512xf32>
    %3 = vector.shape_cast %2 : vector<1x25x512xf32> to vector<25x512xf32>
    %cst = arith.constant dense<0.000000e+00> : vector<20x512xf32>
    %4 = tpu.matmul %0, %3, %cst {dimension_numbers = #tpu.dot_dimension_numbers<[1], [0], [0], [1], [0, 0, 1, 1], [], []>} : vector<20x25xf32>, vector<25x512xf32>, vector<20x512xf32> -> vector<20x512xf32>
    %5 = vector.broadcast %1 : vector<20x1xf32> to vector<20x512xf32>
    %6 = arith.addf %4, %5 : vector<20x512xf32>
    %cst_6 = arith.constant 0.000000e+00 : f32
    %7 = vector.broadcast %cst_6 : f32 to vector<20x512xf32>
    %8 = arith.maximumf %6, %7 : vector<20x512xf32>
    %c1 = arith.constant 1 : index
    %c0_7 = arith.constant 0 : index
    %c0_8 = arith.constant 0 : index
    %9 = vector.load %arg1[%c1, %c0_7, %c0_8] : memref<9x25x512xf32, #tpu.memory_space<vmem>>, vector<1x25x512xf32>
    %10 = vector.shape_cast %9 : vector<1x25x512xf32> to vector<25x512xf32>
    %cst_9 = arith.constant dense<0.000000e+00> : vector<20x512xf32>
    %11 = tpu.matmul %0, %10, %cst_9 {dimension_numbers = #tpu.dot_dimension_numbers<[1], [0], [0], [1], [0, 0, 1, 1], [], []>} : vector<20x25xf32>, vector<25x512xf32>, vector<20x512xf32> -> vector<20x512xf32>
    %12 = vector.broadcast %1 : vector<20x1xf32> to vector<20x512xf32>
    %13 = arith.addf %11, %12 : vector<20x512xf32>
    %cst_10 = arith.constant 0.000000e+00 : f32
    %14 = vector.broadcast %cst_10 : f32 to vector<20x512xf32>
    %15 = arith.maximumf %13, %14 : vector<20x512xf32>
    %16 = arith.maximumf %8, %15 : vector<20x512xf32>
    %c2 = arith.constant 2 : index
    %c0_11 = arith.constant 0 : index
    %c0_12 = arith.constant 0 : index
    %17 = vector.load %arg1[%c2, %c0_11, %c0_12] : memref<9x25x512xf32, #tpu.memory_space<vmem>>, vector<1x25x512xf32>
    %18 = vector.shape_cast %17 : vector<1x25x512xf32> to vector<25x512xf32>
    %cst_13 = arith.constant dense<0.000000e+00> : vector<20x512xf32>
    %19 = tpu.matmul %0, %18, %cst_13 {dimension_numbers = #tpu.dot_dimension_numbers<[1], [0], [0], [1], [0, 0, 1, 1], [], []>} : vector<20x25xf32>, vector<25x512xf32>, vector<20x512xf32> -> vector<20x512xf32>
    %20 = vector.broadcast %1 : vector<20x1xf32> to vector<20x512xf32>
    %21 = arith.addf %19, %20 : vector<20x512xf32>
    %cst_14 = arith.constant 0.000000e+00 : f32
    %22 = vector.broadcast %cst_14 : f32 to vector<20x512xf32>
    %23 = arith.maximumf %21, %22 : vector<20x512xf32>
    %24 = arith.maximumf %16, %23 : vector<20x512xf32>
    %c3 = arith.constant 3 : index
    %c0_15 = arith.constant 0 : index
    %c0_16 = arith.constant 0 : index
    %25 = vector.load %arg1[%c3, %c0_15, %c0_16] : memref<9x25x512xf32, #tpu.memory_space<vmem>>, vector<1x25x512xf32>
    %26 = vector.shape_cast %25 : vector<1x25x512xf32> to vector<25x512xf32>
    %cst_17 = arith.constant dense<0.000000e+00> : vector<20x512xf32>
    %27 = tpu.matmul %0, %26, %cst_17 {dimension_numbers = #tpu.dot_dimension_numbers<[1], [0], [0], [1], [0, 0, 1, 1], [], []>} : vector<20x25xf32>, vector<25x512xf32>, vector<20x512xf32> -> vector<20x512xf32>
    %28 = vector.broadcast %1 : vector<20x1xf32> to vector<20x512xf32>
    %29 = arith.addf %27, %28 : vector<20x512xf32>
    %cst_18 = arith.constant 0.000000e+00 : f32
    %30 = vector.broadcast %cst_18 : f32 to vector<20x512xf32>
    %31 = arith.maximumf %29, %30 : vector<20x512xf32>
    %32 = arith.maximumf %24, %31 : vector<20x512xf32>
    %c4 = arith.constant 4 : index
    %c0_19 = arith.constant 0 : index
    %c0_20 = arith.constant 0 : index
    %33 = vector.load %arg1[%c4, %c0_19, %c0_20] : memref<9x25x512xf32, #tpu.memory_space<vmem>>, vector<1x25x512xf32>
    %34 = vector.shape_cast %33 : vector<1x25x512xf32> to vector<25x512xf32>
    %cst_21 = arith.constant dense<0.000000e+00> : vector<20x512xf32>
    %35 = tpu.matmul %0, %34, %cst_21 {dimension_numbers = #tpu.dot_dimension_numbers<[1], [0], [0], [1], [0, 0, 1, 1], [], []>} : vector<20x25xf32>, vector<25x512xf32>, vector<20x512xf32> -> vector<20x512xf32>
    %36 = vector.broadcast %1 : vector<20x1xf32> to vector<20x512xf32>
    %37 = arith.addf %35, %36 : vector<20x512xf32>
    %cst_22 = arith.constant 0.000000e+00 : f32
    %38 = vector.broadcast %cst_22 : f32 to vector<20x512xf32>
    %39 = arith.maximumf %37, %38 : vector<20x512xf32>
    %40 = arith.maximumf %32, %39 : vector<20x512xf32>
    %c5 = arith.constant 5 : index
    %c0_23 = arith.constant 0 : index
    %c0_24 = arith.constant 0 : index
    %41 = vector.load %arg1[%c5, %c0_23, %c0_24] : memref<9x25x512xf32, #tpu.memory_space<vmem>>, vector<1x25x512xf32>
    %42 = vector.shape_cast %41 : vector<1x25x512xf32> to vector<25x512xf32>
    %cst_25 = arith.constant dense<0.000000e+00> : vector<20x512xf32>
    %43 = tpu.matmul %0, %42, %cst_25 {dimension_numbers = #tpu.dot_dimension_numbers<[1], [0], [0], [1], [0, 0, 1, 1], [], []>} : vector<20x25xf32>, vector<25x512xf32>, vector<20x512xf32> -> vector<20x512xf32>
    %44 = vector.broadcast %1 : vector<20x1xf32> to vector<20x512xf32>
    %45 = arith.addf %43, %44 : vector<20x512xf32>
    %cst_26 = arith.constant 0.000000e+00 : f32
    %46 = vector.broadcast %cst_26 : f32 to vector<20x512xf32>
    %47 = arith.maximumf %45, %46 : vector<20x512xf32>
    %48 = arith.maximumf %40, %47 : vector<20x512xf32>
    %c6 = arith.constant 6 : index
    %c0_27 = arith.constant 0 : index
    %c0_28 = arith.constant 0 : index
    %49 = vector.load %arg1[%c6, %c0_27, %c0_28] : memref<9x25x512xf32, #tpu.memory_space<vmem>>, vector<1x25x512xf32>
    %50 = vector.shape_cast %49 : vector<1x25x512xf32> to vector<25x512xf32>
    %cst_29 = arith.constant dense<0.000000e+00> : vector<20x512xf32>
    %51 = tpu.matmul %0, %50, %cst_29 {dimension_numbers = #tpu.dot_dimension_numbers<[1], [0], [0], [1], [0, 0, 1, 1], [], []>} : vector<20x25xf32>, vector<25x512xf32>, vector<20x512xf32> -> vector<20x512xf32>
    %52 = vector.broadcast %1 : vector<20x1xf32> to vector<20x512xf32>
    %53 = arith.addf %51, %52 : vector<20x512xf32>
    %cst_30 = arith.constant 0.000000e+00 : f32
    %54 = vector.broadcast %cst_30 : f32 to vector<20x512xf32>
    %55 = arith.maximumf %53, %54 : vector<20x512xf32>
    %56 = arith.maximumf %48, %55 : vector<20x512xf32>
    %c7 = arith.constant 7 : index
    %c0_31 = arith.constant 0 : index
    %c0_32 = arith.constant 0 : index
    %57 = vector.load %arg1[%c7, %c0_31, %c0_32] : memref<9x25x512xf32, #tpu.memory_space<vmem>>, vector<1x25x512xf32>
    %58 = vector.shape_cast %57 : vector<1x25x512xf32> to vector<25x512xf32>
    %cst_33 = arith.constant dense<0.000000e+00> : vector<20x512xf32>
    %59 = tpu.matmul %0, %58, %cst_33 {dimension_numbers = #tpu.dot_dimension_numbers<[1], [0], [0], [1], [0, 0, 1, 1], [], []>} : vector<20x25xf32>, vector<25x512xf32>, vector<20x512xf32> -> vector<20x512xf32>
    %60 = vector.broadcast %1 : vector<20x1xf32> to vector<20x512xf32>
    %61 = arith.addf %59, %60 : vector<20x512xf32>
    %cst_34 = arith.constant 0.000000e+00 : f32
    %62 = vector.broadcast %cst_34 : f32 to vector<20x512xf32>
    %63 = arith.maximumf %61, %62 : vector<20x512xf32>
    %64 = arith.maximumf %56, %63 : vector<20x512xf32>
    %c8 = arith.constant 8 : index
    %c0_35 = arith.constant 0 : index
    %c0_36 = arith.constant 0 : index
    %65 = vector.load %arg1[%c8, %c0_35, %c0_36] : memref<9x25x512xf32, #tpu.memory_space<vmem>>, vector<1x25x512xf32>
    %66 = vector.shape_cast %65 : vector<1x25x512xf32> to vector<25x512xf32>
    %cst_37 = arith.constant dense<0.000000e+00> : vector<20x512xf32>
    %67 = tpu.matmul %0, %66, %cst_37 {dimension_numbers = #tpu.dot_dimension_numbers<[1], [0], [0], [1], [0, 0, 1, 1], [], []>} : vector<20x25xf32>, vector<25x512xf32>, vector<20x512xf32> -> vector<20x512xf32>
    %68 = vector.broadcast %1 : vector<20x1xf32> to vector<20x512xf32>
    %69 = arith.addf %67, %68 : vector<20x512xf32>
    %cst_38 = arith.constant 0.000000e+00 : f32
    %70 = vector.broadcast %cst_38 : f32 to vector<20x512xf32>
    %71 = arith.maximumf %69, %70 : vector<20x512xf32>
    %72 = arith.maximumf %64, %71 : vector<20x512xf32>
    %c0_39 = arith.constant 0 : index
    %c0_40 = arith.constant 0 : index
    %73 = vector.load %arg4[%c0_39, %c0_40] : memref<20x512xf32, #tpu.memory_space<vmem>>, vector<20x512xf32>
    tpu.vector_store %arg4[%c0_39, %c0_40], %72 {strides = array<i32>} : memref<20x512xf32, #tpu.memory_space<vmem>>, vector<20x512xf32>,
    return
  }
  func.func @transform_0(%arg0: i32) -> (i32, i32, i32) {
    %c0_i32 = arith.constant 0 : i32
    %c0_i32_0 = arith.constant 0 : i32
    %c0_i32_1 = arith.constant 0 : i32
    return %c0_i32, %c0_i32_0, %arg0 : i32, i32, i32
  }
  func.func @transform_1(%arg0: i32) -> (i32, i32) {
    %c0_i32 = arith.constant 0 : i32
    %c0_i32_0 = arith.constant 0 : i32
    %c0_i32_1 = arith.constant 0 : i32
    return %c0_i32, %c0_i32_0 : i32, i32
  }
  func.func @transform_2(%arg0: i32) -> (i32, i32) {
    %c0_i32 = arith.constant 0 : i32
    %c0_i32_0 = arith.constant 0 : i32
    %c0_i32_1 = arith.constant 0 : i32
    return %c0_i32, %c0_i32_0 : i32, i32
  }
  func.func @transform_3(%arg0: i32) -> (i32, i32) {
    %c0_i32 = arith.constant 0 : i32
    %c0_i32_0 = arith.constant 0 : i32
    return %c0_i32, %arg0 : i32, i32
  }
}

module attributes {stable_mosaic.version = 11 : i64} {
  func.func @head_kernel(%arg0: i32, %arg1: memref<8x1280xf32, #tpu.memory_space<vmem>>, %arg2: memref<1280x64xf32, #tpu.memory_space<vmem>>, %arg3: memref<1x64xf32, #tpu.memory_space<vmem>>, %arg4: memref<64x128xf32, #tpu.memory_space<vmem>>, %arg5: memref<1x128xf32, #tpu.memory_space<vmem>>, %arg6: memref<8x128xf32, #tpu.memory_space<vmem>>) attributes {dimension_semantics = [#tpu.dimension_semantics<parallel>], iteration_bounds = array<i64: 1>, scalar_prefetch = 0 : i64, scratch_operands = 0 : i64, tpu.core_type = #tpu.core_type<tc>, window_params = [{transform_indices = @transform_0, window_bounds = array<i64: 8, 1280>}, {pipeline_mode = #tpu.pipeline_mode<synchronous>, transform_indices = @transform_1, window_bounds = array<i64: 1280, 64>}, {pipeline_mode = #tpu.pipeline_mode<synchronous>, transform_indices = @transform_2, window_bounds = array<i64: 1, 64>}, {pipeline_mode = #tpu.pipeline_mode<synchronous>, transform_indices = @transform_3, window_bounds = array<i64: 64, 128>}, {pipeline_mode = #tpu.pipeline_mode<synchronous>, transform_indices = @transform_4, window_bounds = array<i64: 1, 128>}, {transform_indices = @transform_5, window_bounds = array<i64: 8, 128>}]} {
    %c0 = arith.constant 0 : index
    %c0_0 = arith.constant 0 : index
    %0 = vector.load %arg1[%c0, %c0_0] : memref<8x1280xf32, #tpu.memory_space<vmem>>, vector<8x1280xf32>
    %c0_1 = arith.constant 0 : index
    %c0_2 = arith.constant 0 : index
    %1 = vector.load %arg2[%c0_1, %c0_2] : memref<1280x64xf32, #tpu.memory_space<vmem>>, vector<1280x64xf32>
    %cst = arith.constant dense<0.000000e+00> : vector<8x64xf32>
    %2 = tpu.matmul %0, %1, %cst {dimension_numbers = #tpu.dot_dimension_numbers<[1], [0], [0], [1], [0, 0, 1, 1], [], []>} : vector<8x1280xf32>, vector<1280x64xf32>, vector<8x64xf32> -> vector<8x64xf32>
    %c0_3 = arith.constant 0 : index
    %c0_4 = arith.constant 0 : index
    %3 = vector.load %arg3[%c0_3, %c0_4] : memref<1x64xf32, #tpu.memory_space<vmem>>, vector<1x64xf32>
    %4 = vector.broadcast %3 : vector<1x64xf32> to vector<8x64xf32>
    %5 = arith.addf %2, %4 : vector<8x64xf32>
    %cst_5 = arith.constant 0.000000e+00 : f32
    %6 = vector.broadcast %cst_5 : f32 to vector<8x64xf32>
    %7 = arith.maximumf %5, %6 : vector<8x64xf32>
    %c0_6 = arith.constant 0 : index
    %c0_7 = arith.constant 0 : index
    %8 = vector.load %arg4[%c0_6, %c0_7] : memref<64x128xf32, #tpu.memory_space<vmem>>, vector<64x128xf32>
    %cst_8 = arith.constant dense<0.000000e+00> : vector<8x128xf32>
    %9 = tpu.matmul %7, %8, %cst_8 {dimension_numbers = #tpu.dot_dimension_numbers<[1], [0], [0], [1], [0, 0, 1, 1], [], []>} : vector<8x64xf32>, vector<64x128xf32>, vector<8x128xf32> -> vector<8x128xf32>
    %c0_9 = arith.constant 0 : index
    %c0_10 = arith.constant 0 : index
    %10 = vector.load %arg5[%c0_9, %c0_10] : memref<1x128xf32, #tpu.memory_space<vmem>>, vector<1x128xf32>
    %11 = vector.broadcast %10 : vector<1x128xf32> to vector<8x128xf32>
    %12 = arith.addf %9, %11 : vector<8x128xf32>
    %cst_11 = arith.constant dense<0xFF800000> : vector<8xf32>
    %13 = vector.multi_reduction <maximumf>, %12, %cst_11 [1] : vector<8x128xf32> to vector<8xf32>
    %14 = vector.shape_cast %13 : vector<8xf32> to vector<8x1xf32>
    %15 = vector.broadcast %14 : vector<8x1xf32> to vector<8x128xf32>
    %16 = arith.subf %12, %15 : vector<8x128xf32>
    %17 = math.exp %16 : vector<8x128xf32>
    %cst_12 = arith.constant dense<0.000000e+00> : vector<8xf32>
    %18 = vector.multi_reduction <add>, %17, %cst_12 [1] : vector<8x128xf32> to vector<8xf32>
    %19 = vector.shape_cast %18 : vector<8xf32> to vector<8x1xf32>
    %20 = math.log %19 : vector<8x1xf32>
    %21 = arith.addf %14, %20 : vector<8x1xf32>
    %22 = vector.broadcast %21 : vector<8x1xf32> to vector<8x128xf32>
    %23 = arith.subf %12, %22 : vector<8x128xf32>
    %c0_13 = arith.constant 0 : index
    %c0_14 = arith.constant 0 : index
    %24 = vector.load %arg6[%c0_13, %c0_14] : memref<8x128xf32, #tpu.memory_space<vmem>>, vector<8x128xf32>
    tpu.vector_store %arg6[%c0_13, %c0_14], %23 {strides = array<i32>} : memref<8x128xf32, #tpu.memory_space<vmem>>, vector<8x128xf32>,
    return
  }
  func.func @transform_0(%arg0: i32) -> (i32, i32) {
    %c0_i32 = arith.constant 0 : i32
    %c0_i32_0 = arith.constant 0 : i32
    return %arg0, %c0_i32 : i32, i32
  }
  func.func @transform_1(%arg0: i32) -> (i32, i32) {
    %c0_i32 = arith.constant 0 : i32
    %c0_i32_0 = arith.constant 0 : i32
    %c0_i32_1 = arith.constant 0 : i32
    return %c0_i32, %c0_i32_0 : i32, i32
  }
  func.func @transform_2(%arg0: i32) -> (i32, i32) {
    %c0_i32 = arith.constant 0 : i32
    %c0_i32_0 = arith.constant 0 : i32
    %c0_i32_1 = arith.constant 0 : i32
    return %c0_i32, %c0_i32_0 : i32, i32
  }
  func.func @transform_3(%arg0: i32) -> (i32, i32) {
    %c0_i32 = arith.constant 0 : i32
    %c0_i32_0 = arith.constant 0 : i32
    %c0_i32_1 = arith.constant 0 : i32
    return %c0_i32, %c0_i32_0 : i32, i32
  }
  func.func @transform_4(%arg0: i32) -> (i32, i32) {
    %c0_i32 = arith.constant 0 : i32
    %c0_i32_0 = arith.constant 0 : i32
    %c0_i32_1 = arith.constant 0 : i32
    return %c0_i32, %c0_i32_0 : i32, i32
  }
  func.func @transform_5(%arg0: i32) -> (i32, i32) {
    %c0_i32 = arith.constant 0 : i32
    %c0_i32_0 = arith.constant 0 : i32
    return %arg0, %c0_i32 : i32, i32
  }
}

</mosaic_0001>

<bundles_post_ra>
// kernel: cnn_forward.3
= control target key start
LH: loop header
LB: loop body
LE: loop exit
PB: predicated region body
PF: predicated region fallthrough
CT: control target
= control target key end

     0   :  { %vm407_vm0 = vcmask 523264   ;;  %s1027_s1 = inlined_call_operand.vmem [shape: f32[1280,64], index: 1, kind: input, shape index: {}]   ;;  %s1028_s2 = inlined_call_operand.vmem [shape: f32[1,64], index: 2, kind: input, shape index: {}]   ;;  %s1029_s0 = inlined_call_operand.vmem [shape: f32[8,1280], index: 0, kind: input, shape index: {}]   ;;  %s1030_s4 = inlined_call_operand.vmem [shape: f32[1,128], index: 4, kind: input, shape index: {}]   ;;  %s1031_s3 = inlined_call_operand.vmem [shape: f32[64,128], index: 3, kind: input, shape index: {}]   ;;  %s1032_s5 = inlined_call_operand.vmem [shape: f32[8,128], index: 5, kind: output, shape index: {}]  }
   0x1   :  { %v45_v0 = vld [vmem:[%s1027_s1 + $0x78] sm:$0xff]  ;;  %v44_v1 = vld [vmem:[%s1027_s1 + $0x70] sm:$0xff]  ;;  %v43_v4 = vld [vmem:[%s1027_s1 + $0x68] sm:$0xff] }
   0x2   :  { %v61_v2 = vld [vmem:[%s1027_s1 + $0xf8] sm:$0xff]  ;;  %194 = vmatpush.msra.mxu0 %v45_v0  ;;  %v60_v3 = vld [vmem:[%s1027_s1 + $0xf0] sm:$0xff]  ;;  %v59_v5 = vld [vmem:[%s1027_s1 + $0xe8] sm:$0xff] }
   0x3   :  { %214 = vmatpush.msra.mxu1 %v61_v2  ;;  %v77_v6 = vld [vmem:[%s1027_s1 + $0x178] sm:$0xff]  ;;  %v76_v7 = vld [vmem:[%s1027_s1 + $0x170] sm:$0xff]  ;;  %v42_v9 = vld [vmem:[%s1027_s1 + $0x60] sm:$0xff] }
   0x4   :  { %195 = vmatpush.msra.mxu0 %v44_v1  ;;  %v93_v8 = vld [vmem:[%s1027_s1 + $0x1f8] sm:$0xff]  ;;  %234 = vmatpush.msra.mxu2 %v77_v6  ;;  %v58_v10 = vld [vmem:[%s1027_s1 + $0xe0] sm:$0xff]  ;;  %v75_v11 = vld [vmem:[%s1027_s1 + $0x168] sm:$0xff] }
   0x5   :  { %215 = vmatpush.msra.mxu1 %v60_v3  ;;  %254 = vmatpush.msra.mxu3 %v93_v8  ;;  %v92_v12 = vld [vmem:[%s1027_s1 + $0x1f0] sm:$0xff]  ;;  %v41_v13 = vld [vmem:[%s1027_s1 + $0x58] sm:$0xff]  ;;  %v91_v15 = vld [vmem:[%s1027_s1 + $0x1e8] sm:$0xff] }
   0x6   :  { %196 = vmatpush.msra.mxu0 %v43_v4  ;;  %235 = vmatpush.msra.mxu2 %v76_v7  ;;  %v57_v14 = vld [vmem:[%s1027_s1 + $0xd8] sm:$0xff]  ;;  %v74_v16 = vld [vmem:[%s1027_s1 + $0x160] sm:$0xff]  ;;  %v40_v18 = vld [vmem:[%s1027_s1 + $0x50] sm:$0xff] }
   0x7   :  { %216 = vmatpush.msra.mxu1 %v59_v5  ;;  %255 = vmatpush.msra.mxu3 %v92_v12  ;;  %v90_v17 = vld [vmem:[%s1027_s1 + $0x1e0] sm:$0xff]  ;;  %v56_v19 = vld [vmem:[%s1027_s1 + $0xd0] sm:$0xff]  ;;  %v73_v20 = vld [vmem:[%s1027_s1 + $0x158] sm:$0xff] }
   0x8   :  { %197 = vmatpush.msra.mxu0 %v42_v9  ;;  %236 = vmatpush.msra.mxu2 %v75_v11  ;;  %v89_v21 = vld [vmem:[%s1027_s1 + $0x1d8] sm:$0xff]  ;;  %v39_v22 = vld [vmem:[%s1027_s1 + $0x48] sm:$0xff]  ;;  %v72_v24 = vld [vmem:[%s1027_s1 + $0x150] sm:$0xff] }
   0x9   :  { %217 = vmatpush.msra.mxu1 %v58_v10  ;;  %256 = vmatpush.msra.mxu3 %v91_v15  ;;  %v55_v23 = vld [vmem:[%s1027_s1 + $0xc8] sm:$0xff]  ;;  %v88_v25 = vld [vmem:[%s1027_s1 + $0x1d0] sm:$0xff]  ;;  %v38_v26 = vld [vmem:[%s1027_s1 + $0x40] sm:$0xff] }
   0xa   :  { %198 = vmatpush.msra.mxu0 %v41_v13  ;;  %237 = vmatpush.msra.mxu2 %v74_v16  ;;  %v54_v27 = vld [vmem:[%s1027_s1 + $0xc0] sm:$0xff]  ;;  %v71_v28 = vld [vmem:[%s1027_s1 + $0x148] sm:$0xff]  ;;  %v37_v30 = vld [vmem:[%s1027_s1 + $0x38] sm:$0xff] }
   0xb   :  { %218 = vmatpush.msra.mxu1 %v57_v14  ;;  %257 = vmatpush.msra.mxu3 %v90_v17  ;;  %v87_v29 = vld [vmem:[%s1027_s1 + $0x1c8] sm:$0xff]  ;;  %v53_v31 = vld [vmem:[%s1027_s1 + $0xb8] sm:$0xff]  ;;  %v70_v32 = vld [vmem:[%s1027_s1 + $0x140] sm:$0xff] }
   0xc   :  { %199 = vmatpush.msra.mxu0 %v40_v18  ;;  %238 = vmatpush.msra.mxu2 %v73_v20  ;;  %v86_v33 = vld [vmem:[%s1027_s1 + $0x1c0] sm:$0xff]  ;;  %v36_v34 = vld [vmem:[%s1027_s1 + $0x30] sm:$0xff]  ;;  %v69_v36 = vld [vmem:[%s1027_s1 + $0x138] sm:$0xff] }
   0xd   :  { %219 = vmatpush.msra.mxu1 %v56_v19  ;;  %258 = vmatpush.msra.mxu3 %v89_v21  ;;  %v52_v35 = vld [vmem:[%s1027_s1 + $0xb0] sm:$0xff]  ;;  %v85_v37 = vld [vmem:[%s1027_s1 + $0x1b8] sm:$0xff]  ;;  %v35_v38 = vld [vmem:[%s1027_s1 + $0x28] sm:$0xff] }
   0xe   :  { %200 = vmatpush.msra.mxu0 %v39_v22  ;;  %239 = vmatpush.msra.mxu2 %v72_v24  ;;  %v51_v39 = vld [vmem:[%s1027_s1 + $0xa8] sm:$0xff]  ;;  %v68_v40 = vld [vmem:[%s1027_s1 + $0x130] sm:$0xff]  ;;  %v34_v42 = vld [vmem:[%s1027_s1 + $0x20] sm:$0xff] }
   0xf   :  { %220 = vmatpush.msra.mxu1 %v55_v23  ;;  %259 = vmatpush.msra.mxu3 %v88_v25  ;;  %v84_v41 = vld [vmem:[%s1027_s1 + $0x1b0] sm:$0xff]  ;;  %v50_v43 = vld [vmem:[%s1027_s1 + $0xa0] sm:$0xff]  ;;  %v67_v44 = vld [vmem:[%s1027_s1 + $0x128] sm:$0xff] }
  0x10   :  { %201 = vmatpush.msra.mxu0 %v38_v26  ;;  %240 = vmatpush.msra.mxu2 %v71_v28  ;;  %v83_v45 = vld [vmem:[%s1027_s1 + $0x1a8] sm:$0xff]  ;;  %v33_v46 = vld [vmem:[%s1027_s1 + $0x18] sm:$0xff]  ;;  %v66_v48 = vld [vmem:[%s1027_s1 + $0x120] sm:$0xff] }
  0x11   :  { %221 = vmatpush.msra.mxu1 %v54_v27  ;;  %260 = vmatpush.msra.mxu3 %v87_v29  ;;  %v49_v47 = vld [vmem:[%s1027_s1 + $0x98] sm:$0xff]  ;;  %v82_v49 = vld [vmem:[%s1027_s1 + $0x1a0] sm:$0xff]  ;;  %v32_v50 = vld [vmem:[%s1027_s1 + $0x10] sm:$0xff] }
  0x12   :  { %202 = vmatpush.msra.mxu0 %v37_v30  ;;  %241 = vmatpush.msra.mxu2 %v70_v32  ;;  %v48_v51 = vld [vmem:[%s1027_s1 + $0x90] sm:$0xff]  ;;  %v65_v52 = vld [vmem:[%s1027_s1 + $0x118] sm:$0xff]  ;;  %v31_v54 = vld [vmem:[%s1027_s1 + $0x8] sm:$0xff] }
  0x13   :  { %222 = vmatpush.msra.mxu1 %v53_v31  ;;  %261 = vmatpush.msra.mxu3 %v86_v33  ;;  %v81_v53 = vld [vmem:[%s1027_s1 + $0x198] sm:$0xff]  ;;  %v47_v55 = vld [vmem:[%s1027_s1 + $0x88] sm:$0xff]  ;;  %v64_v56 = vld [vmem:[%s1027_s1 + $0x110] sm:$0xff] }
  0x14   :  { %203 = vmatpush.msra.mxu0 %v36_v34  ;;  %242 = vmatpush.msra.mxu2 %v69_v36  ;;  %v80_v57 = vld [vmem:[%s1027_s1 + $0x190] sm:$0xff]  ;;  %v30_v58 = vld [vmem:[%s1027_s1] sm:$0xff]  ;;  %v109_v60 = vld [vmem:[%s1027_s1 + $0x278] sm:$0xff] }
  0x15   :  { %223 = vmatpush.msra.mxu1 %v52_v35  ;;  %262 = vmatpush.msra.mxu3 %v85_v37  ;;  %v46_v59 = vld [vmem:[%s1027_s1 + $0x80] sm:$0xff]  ;;  %v125_v61 = vld [vmem:[%s1027_s1 + $0x2f8] sm:$0xff]  ;;  %v63_v62 = vld [vmem:[%s1027_s1 + $0x108] sm:$0xff] }
  0x16   :  { %204 = vmatpush.msra.mxu0 %v35_v38  ;;  %243 = vmatpush.msra.mxu2 %v68_v40  ;;  %v79_v63 = vld [vmem:[%s1027_s1 + $0x188] sm:$0xff]  ;;  %v108_v0 = vld [vmem:[%s1027_s1 + $0x270] sm:$0xff]  ;;  %v62_v2 = vld [vmem:[%s1027_s1 + $0x100] sm:$0xff] }
  0x17   :  { %224 = vmatpush.msra.mxu1 %v51_v39  ;;  %263 = vmatpush.msra.mxu3 %v84_v41  ;;  %v124_v1 = vld [vmem:[%s1027_s1 + $0x2f0] sm:$0xff]  ;;  %v78_v3 = vld [vmem:[%s1027_s1 + $0x180] sm:$0xff]  ;;  %v107_v4 = vld [vmem:[%s1027_s1 + $0x268] sm:$0xff] }
  0x18   :  { %205 = vmatpush.msra.mxu0 %v34_v42  ;;  %244 = vmatpush.msra.mxu2 %v67_v44  ;;  %v123_v5 = vld [vmem:[%s1027_s1 + $0x2e8] sm:$0xff]  ;;  %v141_v6 = vld [vmem:[%s1027_s1 + $0x378] sm:$0xff]  ;;  %v106_v8 = vld [vmem:[%s1027_s1 + $0x260] sm:$0xff] }
  0x19   :  { %225 = vmatpush.msra.mxu1 %v50_v43  ;;  %264 = vmatpush.msra.mxu3 %v83_v45  ;;  %v157_v7 = vld [vmem:[%s1027_s1 + $0x3f8] sm:$0xff]  ;;  %v122_v9 = vld [vmem:[%s1027_s1 + $0x2e0] sm:$0xff]  ;;  %v140_v10 = vld [vmem:[%s1027_s1 + $0x370] sm:$0xff] }
  0x1a   :  { %206 = vmatpush.msra.mxu0 %v33_v46  ;;  %245 = vmatpush.msra.mxu2 %v66_v48  ;;  %v156_v11 = vld [vmem:[%s1027_s1 + $0x3f0] sm:$0xff]  ;;  %v105_v12 = vld [vmem:[%s1027_s1 + $0x258] sm:$0xff]  ;;  %v139_v14 = vld [vmem:[%s1027_s1 + $0x368] sm:$0xff] }
  0x1b   :  { %226 = vmatpush.msra.mxu1 %v49_v47  ;;  %265 = vmatpush.msra.mxu3 %v82_v49  ;;  %v121_v13 = vld [vmem:[%s1027_s1 + $0x2d8] sm:$0xff]  ;;  %v155_v15 = vld [vmem:[%s1027_s1 + $0x3e8] sm:$0xff]  ;;  %v104_v16 = vld [vmem:[%s1027_s1 + $0x250] sm:$0xff] }
  0x1c   :  { %207 = vmatpush.msra.mxu0 %v32_v50  ;;  %246 = vmatpush.msra.mxu2 %v65_v52  ;;  %v120_v17 = vld [vmem:[%s1027_s1 + $0x2d0] sm:$0xff]  ;;  %v138_v18 = vld [vmem:[%s1027_s1 + $0x360] sm:$0xff]  ;;  %v103_v20 = vld [vmem:[%s1027_s1 + $0x248] sm:$0xff] }
  0x1d   :  { %227 = vmatpush.msra.mxu1 %v48_v51  ;;  %266 = vmatpush.msra.mxu3 %v81_v53  ;;  %v154_v19 = vld [vmem:[%s1027_s1 + $0x3e0] sm:$0xff]  ;;  %v119_v21 = vld [vmem:[%s1027_s1 + $0x2c8] sm:$0xff]  ;;  %v137_v22 = vld [vmem:[%s1027_s1 + $0x358] sm:$0xff] }
  0x1e   :  { %208 = vmatpush.msra.mxu0 %v31_v54  ;;  %247 = vmatpush.msra.mxu2 %v64_v56  ;;  %v153_v23 = vld [vmem:[%s1027_s1 + $0x3d8] sm:$0xff]  ;;  %v102_v24 = vld [vmem:[%s1027_s1 + $0x240] sm:$0xff]  ;;  %v136_v26 = vld [vmem:[%s1027_s1 + $0x350] sm:$0xff] }
  0x1f   :  { %228 = vmatpush.msra.mxu1 %v47_v55  ;;  %267 = vmatpush.msra.mxu3 %v80_v57  ;;  %v118_v25 = vld [vmem:[%s1027_s1 + $0x2c0] sm:$0xff]  ;;  %v152_v27 = vld [vmem:[%s1027_s1 + $0x3d0] sm:$0xff]  ;;  %v101_v28 = vld [vmem:[%s1027_s1 + $0x238] sm:$0xff] }
  0x20   :  { %209 = vmatpush.msra.mxu0 %v30_v58  ;;  %248 = vmatpush.msra.mxu2 %v63_v62  ;;  %v117_v29 = vld [vmem:[%s1027_s1 + $0x2b8] sm:$0xff]  ;;  %v135_v30 = vld [vmem:[%s1027_s1 + $0x348] sm:$0xff]  ;;  %v100_v32 = vld [vmem:[%s1027_s1 + $0x230] sm:$0xff] }
  0x21   :  { %229 = vmatpush.msra.mxu1 %v46_v59  ;;  %268 = vmatpush.msra.mxu3 %v79_v63  ;;  %v151_v31 = vld [vmem:[%s1027_s1 + $0x3c8] sm:$0xff]  ;;  %v116_v33 = vld [vmem:[%s1027_s1 + $0x2b0] sm:$0xff]  ;;  %v134_v34 = vld [vmem:[%s1027_s1 + $0x340] sm:$0xff] }
  0x22   :  { %274 = vmatpush.msrb.mxu0 %v109_v60  ;;  %249 = vmatpush.msra.mxu2 %v62_v2  ;;  %v150_v35 = vld [vmem:[%s1027_s1 + $0x3c0] sm:$0xff]  ;;  %v99_v36 = vld [vmem:[%s1027_s1 + $0x228] sm:$0xff]  ;;  %v133_v38 = vld [vmem:[%s1027_s1 + $0x338] sm:$0xff] }
  0x23   :  { %294 = vmatpush.msrb.mxu1 %v125_v61  ;;  %269 = vmatpush.msra.mxu3 %v78_v3  ;;  %v115_v37 = vld [vmem:[%s1027_s1 + $0x2a8] sm:$0xff]  ;;  %v149_v39 = vld [vmem:[%s1027_s1 + $0x3b8] sm:$0xff]  ;;  %v98_v40 = vld [vmem:[%s1027_s1 + $0x220] sm:$0xff] }
  0x24   :  { %275 = vmatpush.msrb.mxu0 %v108_v0  ;;  %314 = vmatpush.msrb.mxu2 %v141_v6  ;;  %v114_v41 = vld [vmem:[%s1027_s1 + $0x2a0] sm:$0xff]  ;;  %v132_v42 = vld [vmem:[%s1027_s1 + $0x330] sm:$0xff]  ;;  %v97_v44 = vld [vmem:[%s1027_s1 + $0x218] sm:$0xff] }
  0x25   :  { %295 = vmatpush.msrb.mxu1 %v124_v1  ;;  %334 = vmatpush.msrb.mxu3 %v157_v7  ;;  %v148_v43 = vld [vmem:[%s1027_s1 + $0x3b0] sm:$0xff]  ;;  %v113_v45 = vld [vmem:[%s1027_s1 + $0x298] sm:$0xff]  ;;  %v131_v46 = vld [vmem:[%s1027_s1 + $0x328] sm:$0xff] }
  0x26   :  { %276 = vmatpush.msrb.mxu0 %v107_v4  ;;  %315 = vmatpush.msrb.mxu2 %v140_v10  ;;  %v147_v47 = vld [vmem:[%s1027_s1 + $0x3a8] sm:$0xff]  ;;  %v96_v48 = vld [vmem:[%s1027_s1 + $0x210] sm:$0xff]  ;;  %v130_v50 = vld [vmem:[%s1027_s1 + $0x320] sm:$0xff] }
  0x27   :  { %296 = vmatpush.msrb.mxu1 %v123_v5  ;;  %335 = vmatpush.msrb.mxu3 %v156_v11  ;;  %v112_v49 = vld [vmem:[%s1027_s1 + $0x290] sm:$0xff]  ;;  %v146_v51 = vld [vmem:[%s1027_s1 + $0x3a0] sm:$0xff]  ;;  %v95_v52 = vld [vmem:[%s1027_s1 + $0x208] sm:$0xff] }
  0x28   :  { %277 = vmatpush.msrb.mxu0 %v106_v8  ;;  %316 = vmatpush.msrb.mxu2 %v139_v14  ;;  %v22_v53 = vld [vmem:[%s1029_s0 + $0x10] sm:$0xff]  ;;  %v111_v54 = vld [vmem:[%s1027_s1 + $0x288] sm:$0xff]  ;;  %v129_v55 = vld [vmem:[%s1027_s1 + $0x318] sm:$0xff] }
  0x29   :  { %297 = vmatpush.msrb.mxu1 %v122_v9  ;;  %336 = vmatpush.msrb.mxu3 %v155_v15  ;;  %v94_v56 = vld [vmem:[%s1027_s1 + $0x200] sm:$0xff]  ;;  %v23_v57 = vld [vmem:[%s1029_s0 + $0x18] sm:$0xff]  ;;  %v128_v61 = vld [vmem:[%s1027_s1 + $0x310] sm:$0xff] }
  0x2a   :  { %278 = vmatpush.msrb.mxu0 %v105_v12  ;;  %317 = vmatpush.msrb.mxu2 %v138_v18  ;;  %v20_v58 = vld [vmem:[%s1029_s0] sm:$0xff]  ;;  %v173_v60 = vld [vmem:[%s1027_s1 + $0x478] sm:$0xff]  ;;  %v21_v63 = vld [vmem:[%s1029_s0 + $0x8] sm:$0xff] }
  0x2b   :  { %298 = vmatpush.msrb.mxu1 %v121_v13  ;;  %337 = vmatpush.msrb.mxu3 %v154_v19  ;;  %v110_v59 = vld [vmem:[%s1027_s1 + $0x280] sm:$0xff]  ;;  %v145_v62 = vld [vmem:[%s1027_s1 + $0x398] sm:$0xff]  ;;  %v172_v0 = vld [vmem:[%s1027_s1 + $0x470] sm:$0xff] }
  0x2c   :  { %279 = vmatpush.msrb.mxu0 %v104_v16  ;;  %318 = vmatpush.msrb.mxu2 %v137_v22  ;;  %v189_v1 = vld [vmem:[%s1027_s1 + $0x4f8] sm:$0xff]  ;;  %v127_v2 = vld [vmem:[%s1027_s1 + $0x308] sm:$0xff]  ;;  %v144_v3 = vld [vmem:[%s1027_s1 + $0x390] sm:$0xff] }
  0x2d   :  { %299 = vmatpush.msrb.mxu1 %v120_v17  ;;  %338 = vmatpush.msrb.mxu3 %v153_v23  ;;  %v171_v4 = vld [vmem:[%s1027_s1 + $0x468] sm:$0xff]  ;;  %v188_v5 = vld [vmem:[%s1027_s1 + $0x4f0] sm:$0xff]  ;;  %v126_v6 = vld [vmem:[%s1027_s1 + $0x300] sm:$0xff] }
  0x2e   :  { %280 = vmatpush.msrb.mxu0 %v103_v20  ;;  %319 = vmatpush.msrb.mxu2 %v136_v26  ;;  %v143_v7 = vld [vmem:[%s1027_s1 + $0x388] sm:$0xff]  ;;  %v26_v8 = vld [vmem:[%s1029_s0 + $0x30] sm:$0xff]  ;;  %v170_v9 = vld [vmem:[%s1027_s1 + $0x460] sm:$0xff] }
  0x2f   :  { %300 = vmatpush.msrb.mxu1 %v119_v21  ;;  %339 = vmatpush.msrb.mxu3 %v152_v27  ;;  %v187_v10 = vld [vmem:[%s1027_s1 + $0x4e8] sm:$0xff]  ;;  %v142_v11 = vld [vmem:[%s1027_s1 + $0x380] sm:$0xff]  ;;  %v27_v13 = vld [vmem:[%s1029_s0 + $0x38] sm:$0xff] }
  0x30   :  { %281 = vmatpush.msrb.mxu0 %v102_v24  ;;  %320 = vmatpush.msrb.mxu2 %v135_v30  ;;  %v24_v12 = vld [vmem:[%s1029_s0 + $0x20] sm:$0xff]  ;;  %v169_v14 = vld [vmem:[%s1027_s1 + $0x458] sm:$0xff]  ;;  %v25_v16 = vld [vmem:[%s1029_s0 + $0x28] sm:$0xff] }
  0x31   :  { %301 = vmatpush.msrb.mxu1 %v118_v25  ;;  %340 = vmatpush.msrb.mxu3 %v151_v31  ;;  %v186_v15 = vld [vmem:[%s1027_s1 + $0x4e0] sm:$0xff]  ;;  %v168_v17 = vld [vmem:[%s1027_s1 + $0x450] sm:$0xff]  ;;  %v185_v18 = vld [vmem:[%s1027_s1 + $0x4d8] sm:$0xff] }
  0x32   :  { %282 = vmatpush.msrb.mxu0 %v101_v28  ;;  %321 = vmatpush.msrb.mxu2 %v134_v34  ;;  %v167_v19 = vld [vmem:[%s1027_s1 + $0x448] sm:$0xff]  ;;  %v184_v20 = vld [vmem:[%s1027_s1 + $0x4d0] sm:$0xff]  ;;  %v166_v21 = vld [vmem:[%s1027_s1 + $0x440] sm:$0xff] }
  0x33   :  { %302 = vmatpush.msrb.mxu1 %v117_v29  ;;  %341 = vmatpush.msrb.mxu3 %v150_v35  ;;  %v183_v22 = vld [vmem:[%s1027_s1 + $0x4c8] sm:$0xff]  ;;  %v165_v23 = vld [vmem:[%s1027_s1 + $0x438] sm:$0xff]  ;;  %v182_v24 = vld [vmem:[%s1027_s1 + $0x4c0] sm:$0xff] }
  0x34   :  { %283 = vmatpush.msrb.mxu0 %v100_v32  ;;  %322 = vmatpush.msrb.mxu2 %v133_v38  ;;  %v164_v25 = vld [vmem:[%s1027_s1 + $0x430] sm:$0xff]  ;;  %v181_v26 = vld [vmem:[%s1027_s1 + $0x4b8] sm:$0xff]  ;;  %v163_v27 = vld [vmem:[%s1027_s1 + $0x428] sm:$0xff] }
  0x35   :  { %303 = vmatpush.msrb.mxu1 %v116_v33  ;;  %342 = vmatpush.msrb.mxu3 %v149_v39  ;;  %v180_v28 = vld [vmem:[%s1027_s1 + $0x4b0] sm:$0xff]  ;;  %v162_v29 = vld [vmem:[%s1027_s1 + $0x420] sm:$0xff]  ;;  %v179_v30 = vld [vmem:[%s1027_s1 + $0x4a8] sm:$0xff] }
  0x36   :  { %284 = vmatpush.msrb.mxu0 %v99_v36  ;;  %323 = vmatpush.msrb.mxu2 %v132_v42  ;;  %v161_v31 = vld [vmem:[%s1027_s1 + $0x418] sm:$0xff]  ;;  %v178_v32 = vld [vmem:[%s1027_s1 + $0x4a0] sm:$0xff]  ;;  %v160_v33 = vld [vmem:[%s1027_s1 + $0x410] sm:$0xff] }
  0x37   :  { %304 = vmatpush.msrb.mxu1 %v115_v37  ;;  %343 = vmatpush.msrb.mxu3 %v148_v43  ;;  %v177_v34 = vld [vmem:[%s1027_s1 + $0x498] sm:$0xff]  ;;  %v159_v35 = vld [vmem:[%s1027_s1 + $0x408] sm:$0xff]  ;;  %v176_v36 = vld [vmem:[%s1027_s1 + $0x490] sm:$0xff] }
  0x38   :  { %285 = vmatpush.msrb.mxu0 %v98_v40  ;;  %324 = vmatpush.msrb.mxu2 %v131_v46  ;;  %v158_v37 = vld [vmem:[%s1027_s1 + $0x400] sm:$0xff]  ;;  %v175_v38 = vld [vmem:[%s1027_s1 + $0x488] sm:$0xff]  ;;  %v402_v42 = vld [vmem:[%s1031_s3 + $0x38] sm:$0xff] }
  0x39   :  { %305 = vmatpush.msrb.mxu1 %v114_v41  ;;  %344 = vmatpush.msrb.mxu3 %v147_v47  ;;  %v28_v39 = vld [vmem:[%s1029_s0 + $0x40] sm:$0xff]  ;;  %v29_v41 = vld [vmem:[%s1029_s0 + $0x48] sm:$0xff]  ;;  %v401_v43 = vld [vmem:[%s1031_s3 + $0x30] sm:$0xff] }
  0x3a   :  { %286 = vmatpush.msrb.mxu0 %v97_v44  ;;  %325 = vmatpush.msrb.mxu2 %v130_v50  ;;  %v174_v40 = vld [vmem:[%s1027_s1 + $0x480] sm:$0xff]  ;;  %v400_v44 = vld [vmem:[%s1031_s3 + $0x28] sm:$0xff]  ;;  %v398_v47 = vld [vmem:[%s1031_s3 + $0x18] sm:$0xff] }
  0x3b   :  { %306 = vmatpush.msrb.mxu1 %v113_v45  ;;  %345 = vmatpush.msrb.mxu3 %v146_v51  ;;  %v399_v45 = vld [vmem:[%s1031_s3 + $0x20] sm:$0xff]  ;;  %v396_v51 = vld [vmem:[%s1031_s3 + $0x8] sm:$0xff] }
  0x3c   :  { %287 = vmatpush.msrb.mxu0 %v96_v48  ;;  %250 = vmatmul.f32.vlgmr.msra.gmra.mxu2 %v22_v53  ;;  %v448_v46 = vld [vmem:[%s1028_s2] ss:$0 sm:$0xff] }
  0x3d   :  { %307 = vmatpush.msrb.mxu1 %v112_v49  ;;  %326 = vmatpush.msrb.mxu2 %v129_v55  ;;  %v397_v49 = vld [vmem:[%s1031_s3 + $0x10] sm:$0xff]  ;;  %v395_v53 = vld [vmem:[%s1031_s3] sm:$0xff] }
  0x3e   :  { %288 = vmatpush.msrb.mxu0 %v95_v52  ;;  %270 = vmatmul.f32.vlgmr.msra.gmra.mxu3 %v23_v57 }
  0x3f   :  { %308 = vmatpush.msrb.mxu1 %v111_v54  ;;  %210 = vmatmul.f32.vlgmr.msra.gmra.mxu0 %v20_v58 }
  0x40   :  { %289 = vmatpush.msrb.mxu0 %v94_v56  ;;  %327 = vmatpush.msrb.mxu2 %v128_v61 }
  0x41   :  { %309 = vmatpush.msrb.mxu1 %v110_v59  ;;  %346 = vmatpush.msrb.mxu3 %v145_v62 }
  0x42   :  { %354 = vmatpush.msra.mxu0 %v173_v60  ;;  %230 = vmatmul.f32.vlgmr.msra.gmra.mxu1 %v21_v63 }
  0x43   :  { %374 = vmatpush.msra.mxu1 %v189_v1  ;;  %328 = vmatpush.msrb.mxu2 %v127_v2 }
  0x44   :  { %355 = vmatpush.msra.mxu0 %v172_v0  ;;  %347 = vmatpush.msrb.mxu3 %v144_v3 }
  0x45   :  { %375 = vmatpush.msra.mxu1 %v188_v5  ;;  %329 = vmatpush.msrb.mxu2 %v126_v6 }
  0x46   :  { %356 = vmatpush.msra.mxu0 %v171_v4  ;;  %348 = vmatpush.msrb.mxu3 %v143_v7 }
  0x47   :  { %330 = vmatmul.f32.vlgmr.msrb.gmra.mxu2 %v26_v8  ;;  %376 = vmatpush.msra.mxu1 %v187_v10  ;;  %v449_v8 = vld [vmem:[%s1030_s4] ss:$0 sm:$0xff] }
  0x48   :  { %357 = vmatpush.msra.mxu0 %v170_v9  ;;  %349 = vmatpush.msrb.mxu3 %v142_v11 }
  0x49   :  { %290 = vmatmul.f32.vlgmr.msrb.gmra.mxu0 %v24_v12  ;;  %350 = vmatmul.f32.vlgmr.msrb.gmra.mxu3 %v27_v13 }
  0x4a   :  { %358 = vmatpush.msra.mxu0 %v169_v14  ;;  %377 = vmatpush.msra.mxu1 %v186_v15 }
  0x4b   :  { %310 = vmatmul.f32.vlgmr.msrb.gmra.mxu1 %v25_v16  ;;  %419 = vmatpush.msra.mxu2 %v402_v42 }
  0x4c   :  { %359 = vmatpush.msra.mxu0 %v168_v17  ;;  %378 = vmatpush.msra.mxu1 %v185_v18 }
  0x4d   :  { %420 = vmatpush.msra.mxu2 %v401_v43 }
  0x4e   :  { %360 = vmatpush.msra.mxu0 %v167_v19  ;;  %379 = vmatpush.msra.mxu1 %v184_v20 }
  0x4f   :  { %421 = vmatpush.msra.mxu2 %v400_v44 }
  0x50   :  { %361 = vmatpush.msra.mxu0 %v166_v21  ;;  %380 = vmatpush.msra.mxu1 %v183_v22 }
  0x51   :  { %422 = vmatpush.msra.mxu2 %v399_v45 }
  0x52   :  { %362 = vmatpush.msra.mxu0 %v165_v23  ;;  %381 = vmatpush.msra.mxu1 %v182_v24 }
  0x53   :  { %423 = vmatpush.msra.mxu2 %v398_v47 }
  0x54   :  { %363 = vmatpush.msra.mxu0 %v164_v25  ;;  %382 = vmatpush.msra.mxu1 %v181_v26 }
  0x55   :  { %424 = vmatpush.msra.mxu2 %v397_v49 }
  0x56   :  { %364 = vmatpush.msra.mxu0 %v163_v27  ;;  %383 = vmatpush.msra.mxu1 %v180_v28 }
  0x57   :  { %425 = vmatpush.msra.mxu2 %v396_v51 }
  0x58   :  { %365 = vmatpush.msra.mxu0 %v162_v29  ;;  %384 = vmatpush.msra.mxu1 %v179_v30 }
  0x59   :  { %426 = vmatpush.msra.mxu2 %v395_v53 }
  0x5a   :  { %366 = vmatpush.msra.mxu0 %v161_v31  ;;  %385 = vmatpush.msra.mxu1 %v178_v32 }
  0x5c   :  { %367 = vmatpush.msra.mxu0 %v160_v33  ;;  %386 = vmatpush.msra.mxu1 %v177_v34 }
  0x5e   :  { %368 = vmatpush.msra.mxu0 %v159_v35  ;;  %387 = vmatpush.msra.mxu1 %v176_v36 }
  0x60   :  { %369 = vmatpush.msra.mxu0 %v158_v37  ;;  %388 = vmatpush.msra.mxu1 %v175_v38 }
  0x61   :  { %370 = vmatmul.f32.vlgmr.msra.gmra.mxu0 %v28_v39 }
  0x62   :  { %389 = vmatpush.msra.mxu1 %v174_v40 }
  0x63   :  { %390 = vmatmul.f32.vlgmr.msra.gmra.mxu1 %v29_v41 }
  0xbc   :  { %v211_v48 = vpop.f32.mrf.mxu0 }
  0xbd   :  { %v212_v50 = vadd.f32 %v448_v46, %v211_v48 }
  0xbf   :  { %v231_v52 = vpop.f32.mrf.mxu1  ;;  %v251_v55 = vpop.f32.mrf.mxu2 }
  0xc0   :  { %v232_v54 = vadd.f32 %v231_v52, %v212_v50 }
  0xc1   :  { %v271_v57 = vpop.f32.mrf.mxu3 }
  0xc2   :  { %v252_v56 = vadd.f32 %v251_v55, %v232_v54 }
  0xc4   :  { %v272_v58 = vadd.f32 %v271_v57, %v252_v56 }
  0xc6   :  { %v291_v59 = vpop.f32.mrf.mxu0 }
  0xc7   :  { %v292_v60 = vadd.f32 %v291_v59, %v272_v58 }
  0xc8   :  { %v311_v61 = vpop.f32.mrf.mxu1 }
  0xc9   :  { %v312_v62 = vadd.f32 %v311_v61, %v292_v60 }
  0xca   :  { %v331_v63 = vpop.f32.mrf.mxu2 }
  0xcb   :  { %v332_v0 = vadd.f32 %v331_v63, %v312_v62 }
  0xcc   :  { %v351_v1 = vpop.f32.mrf.mxu3 }
  0xcd   :  { %v352_v2 = vadd.f32 %v351_v1, %v332_v0 }
  0xde   :  { %v371_v3 = vpop.f32.mrf.mxu0 }
  0xdf   :  { %v372_v4 = vadd.f32 %v371_v3, %v352_v2 }
  0xe0   :  { %v391_v5 = vpop.f32.mrf.mxu1 }
  0xe1   :  { %v392_v6 = vadd.f32 %v391_v5, %v372_v4 }
  0xe3   :  { %v394_v7 = vmax.f32 %v392_v6, 0.0 }
  0xe5   :  { %447 = vmatmul.msk.f32.vlgmr.msra.gmra.mxu2 %vm407_vm0, %v394_v7 }
 0x168   :  { %v428_v9 = vpop.f32.mrf.mxu2 }
 0x169   :  { %v429_v10 = vadd.f32 %v449_v8, %v428_v9 }
 0x16b   :  { %431 = vmax.xlane.f32.xlu0 %v429_v10 }
 0x1de   :  { %v432_v11 = vpop.xlane.xlu0 %431 }
 0x1df   :  { %v433_v12 = vsub.f32 %v429_v10, %v432_v11 }
 0x1e1   :  { %v434_v13 = vmul.f32 1.442695, %v433_v12 }
 0x1e3   :  { %450 = vpow2.f32 %v434_v13 }
 0x1e9   :  { %v451_v14 = vpop.eup %450 }
 0x1ea   :  { %436 = vadd.xlane.f32.xlu0 %v451_v14 }
 0x25d   :  { %v437_v15 = vpop.xlane.xlu0 %436 }
 0x25e   :  { %452 = vlog2.f32 %v437_v15 }
 0x264   :  { %v453_v16 = vpop.eup %452 }
 0x265   :  { %v439_v17 = vmul.f32 0.6931472, %v453_v16 }
 0x267   :  { %v440_v18 = vadd.f32 %v439_v17, %v432_v11 }
 0x269   :  { %v441_v19 = vsub.f32 %v429_v10, %v440_v18 }
 0x26b   :  { %442 = vst [vmem:[%s1032_s5] sm:$0xff] %v441_v19 }

// kernel: cnn_forward.2
= control target key start
LH: loop header
LB: loop body
LE: loop exit
PB: predicated region body
PF: predicated region fallthrough
CT: control target
= control target key end

     0   :  { %vm61_vm0 = vcmask 1040384   ;;  %v1737_v3 = vmov 0   ;;  %vm51_vm1 = vcmask 203776   ;;  %s2748_s0 = inlined_call_operand.vmem [shape: f32[9,25,512], index: 0, kind: input, shape index: {}]   ;;  %s2749_s1 = inlined_call_operand.vmem [shape: f32[20,25], index: 1, kind: input, shape index: {}]   ;;  %s2750_s2 = inlined_call_operand.vmem [shape: f32[20,1], index: 2, kind: input, shape index: {}]   ;;  %s2751_s3 = inlined_call_operand.vmem [shape: f32[20,512], index: 3, kind: output, shape index: {}]  }
   0x1   :  { %v32_v0 = vld [vmem:[%s2748_s0 + $0x60] sm:$0x1]  ;;  %v33_v1 = vld [vmem:[%s2748_s0 + $0x68] sm:$0x1]  ;;  %v34_v2 = vld [vmem:[%s2748_s0 + $0x70] sm:$0x1]  ;;  %1735 = vset.pattern.permute.xlu0 %v1737_v3  ;;  %1736 = vset.pattern.permute.xlu1 %v1737_v3 }
   0x2   :  { %1462 = vmatpush.msk.msra.mxu0 %vm61_vm0, %v32_v0  ;;  %1466 = vmatpush.msk.msra.mxu1 %vm61_vm0, %v33_v1  ;;  %v35_v4 = vld [vmem:[%s2748_s0 + $0x78] sm:$0x1]  ;;  %v28_v5 = vld [vmem:[%s2748_s0 + $0x40] sm:$0xff]  ;;  %v29_v6 = vld [vmem:[%s2748_s0 + $0x48] sm:$0xff] }
   0x3   :  { %1470 = vmatpush.msk.msra.mxu2 %vm61_vm0, %v34_v2  ;;  %1474 = vmatpush.msk.msra.mxu3 %vm61_vm0, %v35_v4  ;;  %v30_v7 = vld [vmem:[%s2748_s0 + $0x50] sm:$0xff]  ;;  %v31_v8 = vld [vmem:[%s2748_s0 + $0x58] sm:$0xff]  ;;  %v24_v9 = vld [vmem:[%s2748_s0 + $0x20] sm:$0xff] }
   0x4   :  { %87 = vmatpush.msra.mxu0 %v28_v5  ;;  %113 = vmatpush.msra.mxu1 %v29_v6  ;;  %v25_v10 = vld [vmem:[%s2748_s0 + $0x28] sm:$0xff]  ;;  %v26_v11 = vld [vmem:[%s2748_s0 + $0x30] sm:$0xff]  ;;  %v27_v12 = vld [vmem:[%s2748_s0 + $0x38] sm:$0xff] }
   0x5   :  { %139 = vmatpush.msra.mxu2 %v30_v7  ;;  %165 = vmatpush.msra.mxu3 %v31_v8  ;;  %v20_v13 = vld [vmem:[%s2748_s0] sm:$0xff]  ;;  %v21_v14 = vld [vmem:[%s2748_s0 + $0x8] sm:$0xff]  ;;  %v22_v15 = vld [vmem:[%s2748_s0 + $0x10] sm:$0xff] }
   0x6   :  { %88 = vmatpush.msra.mxu0 %v24_v9  ;;  %114 = vmatpush.msra.mxu1 %v25_v10  ;;  %v23_v16 = vld [vmem:[%s2748_s0 + $0x18] sm:$0xff]  ;;  %v1813_v17 = vld [vmem:[%s2749_s1] sm:$0xff]  ;;  %v1492_v18 = vld [vmem:[%s2748_s0 + $0xf0] sm:$0x1] }
   0x7   :  { %140 = vmatpush.msra.mxu2 %v26_v11  ;;  %166 = vmatpush.msra.mxu3 %v27_v12  ;;  %v1493_v19 = vld [vmem:[%s2748_s0 + $0xf8] sm:$0x1]  ;;  %v1490_v20 = vld [vmem:[%s2748_s0 + $0xe0] sm:$0x1]  ;;  %v1491_v21 = vld [vmem:[%s2748_s0 + $0xe8] sm:$0x1] }
   0x8   :  { %89 = vmatpush.msra.mxu0 %v20_v13  ;;  %115 = vmatpush.msra.mxu1 %v21_v14  ;;  %v1488_v22 = vld [vmem:[%s2748_s0 + $0xd0] sm:$0xff]  ;;  %v1489_v23 = vld [vmem:[%s2748_s0 + $0xd8] sm:$0xff]  ;;  %v1486_v24 = vld [vmem:[%s2748_s0 + $0xc0] sm:$0xff] }
   0x9   :  { %141 = vmatpush.msra.mxu2 %v22_v15  ;;  %167 = vmatpush.msra.mxu3 %v23_v16  ;;  %v1487_v25 = vld [vmem:[%s2748_s0 + $0xc8] sm:$0xff]  ;;  %v1484_v26 = vld [vmem:[%s2748_s0 + $0xb0] sm:$0xff]  ;;  %v1485_v27 = vld [vmem:[%s2748_s0 + $0xb8] sm:$0xff] }
   0xa   :  { %1463 = vmatmul.msk.f32.vlgmr.msra.gmra.mxu0 %vm51_vm1, %v1813_v17  ;;  %1467 = vmatmul.msk.f32.vlgmr.msra.gmra.mxu1 %vm51_vm1, %v1813_v17  ;;  %v17_v28 = vld [vmem:[%s2750_s2] sm:$0xff]  ;;  %v1866_v30 = vld [vmem:[%s2749_s1 + $0x8] sm:$0xff]  ;;  %v1480_v32 = vld [vmem:[%s2748_s0 + $0x90] sm:$0xff] }
   0xb   :  { %1471 = vmatmul.msk.f32.vlgmr.msra.gmra.mxu2 %vm51_vm1, %v1813_v17  ;;  %1475 = vmatmul.msk.f32.vlgmr.msra.gmra.mxu3 %vm51_vm1, %v1813_v17  ;;  %v1482_v29 = vld [vmem:[%s2748_s0 + $0xa0] sm:$0xff]  ;;  %v1483_v31 = vld [vmem:[%s2748_s0 + $0xa8] sm:$0xff]  ;;  %v1481_v33 = vld [vmem:[%s2748_s0 + $0x98] sm:$0xff] }
   0xc   :  { %1502 = vmatpush.msk.msrb.mxu2 %vm61_vm0, %v1492_v18  ;;  %1506 = vmatpush.msk.msrb.mxu3 %vm61_vm0, %v1493_v19  ;;  %v1478_v34 = vld [vmem:[%s2748_s0 + $0x80] sm:$0xff]  ;;  %v1479_v35 = vld [vmem:[%s2748_s0 + $0x88] sm:$0xff]  ;;  %v1524_v36 = vld [vmem:[%s2748_s0 + $0x170] sm:$0x1] }
   0xd   :  { %1494 = vmatpush.msk.msrb.mxu0 %vm61_vm0, %v1490_v20  ;;  %1498 = vmatpush.msk.msrb.mxu1 %vm61_vm0, %v1491_v21  ;;  %v1525_v37 = vld [vmem:[%s2748_s0 + $0x178] sm:$0x1]  ;;  %v1522_v38 = vld [vmem:[%s2748_s0 + $0x160] sm:$0x1]  ;;  %v1523_v39 = vld [vmem:[%s2748_s0 + $0x168] sm:$0x1] }
   0xe   :  { %284 = vmatpush.msrb.mxu2 %v1488_v22  ;;  %310 = vmatpush.msrb.mxu3 %v1489_v23  ;;  %v1520_v40 = vld [vmem:[%s2748_s0 + $0x150] sm:$0xff]  ;;  %v18_v41 = vld [vmem:[%s2750_s2 + $0x8] sm:$0xff]  ;;  %v1521_v42 = vld [vmem:[%s2748_s0 + $0x158] sm:$0xff] }
   0xf   :  { %232 = vmatpush.msrb.mxu0 %v1486_v24  ;;  %258 = vmatpush.msrb.mxu1 %v1487_v25  ;;  %v1916_v43 = vld [vmem:[%s2749_s1 + $0x10] sm:$0xf]  ;;  %v1518_v45 = vld [vmem:[%s2748_s0 + $0x140] sm:$0xff]  ;;  %v1519_v46 = vld [vmem:[%s2748_s0 + $0x148] sm:$0xff] }
  0x10   :  { %285 = vmatpush.msrb.mxu2 %v1484_v26  ;;  %311 = vmatpush.msrb.mxu3 %v1485_v27  ;;  %v19_v44 = vld [vmem:[%s2750_s2 + $0x10] sm:$0xf]  ;;  %v1517_v48 = vld [vmem:[%s2748_s0 + $0x138] sm:$0xff]  ;;  %v1514_v49 = vld [vmem:[%s2748_s0 + $0x120] sm:$0xff] }
  0x11   :  { %38 = vperm.xlu0 %1735, %v17_v28   ;;  %233 = vmatpush.msrb.mxu0 %v1482_v29  ;;  %v1516_v47 = vld [vmem:[%s2748_s0 + $0x130] sm:$0xff]  ;;  %v1515_v50 = vld [vmem:[%s2748_s0 + $0x128] sm:$0xff]  ;;  %v1513_v52 = vld [vmem:[%s2748_s0 + $0x118] sm:$0xff] }
  0x12   :  { %1464 = vmatmul.msk.f32.gmra.mxu0 %vm51_vm1, %v1866_v30  ;;  %1468 = vmatmul.msk.f32.gmra.mxu1 %vm51_vm1, %v1866_v30  ;;  %v1512_v51 = vld [vmem:[%s2748_s0 + $0x110] sm:$0xff]  ;;  %v1510_v53 = vld [vmem:[%s2748_s0 + $0x100] sm:$0xff]  ;;  %v1511_v54 = vld [vmem:[%s2748_s0 + $0x108] sm:$0xff] }
  0x13   :  { %1472 = vmatmul.msk.f32.gmra.mxu2 %vm51_vm1, %v1866_v30  ;;  %1476 = vmatmul.msk.f32.gmra.mxu3 %vm51_vm1, %v1866_v30  ;;  %v1556_v55 = vld [vmem:[%s2748_s0 + $0x1f0] sm:$0x1]  ;;  %v1557_v56 = vld [vmem:[%s2748_s0 + $0x1f8] sm:$0x1]  ;;  %v1554_v57 = vld [vmem:[%s2748_s0 + $0x1e0] sm:$0x1] }
  0x14   :  { %259 = vmatpush.msrb.mxu1 %v1483_v31  ;;  %286 = vmatpush.msrb.mxu2 %v1480_v32  ;;  %v1555_v58 = vld [vmem:[%s2748_s0 + $0x1e8] sm:$0x1]  ;;  %v1552_v59 = vld [vmem:[%s2748_s0 + $0x1d0] sm:$0xff]  ;;  %v1553_v60 = vld [vmem:[%s2748_s0 + $0x1d8] sm:$0xff] }
  0x15   :  { %312 = vmatpush.msrb.mxu3 %v1481_v33  ;;  %234 = vmatpush.msrb.mxu0 %v1478_v34  ;;  %v1550_v61 = vld [vmem:[%s2748_s0 + $0x1c0] sm:$0xff]  ;;  %v1551_v62 = vld [vmem:[%s2748_s0 + $0x1c8] sm:$0xff]  ;;  %v1548_v63 = vld [vmem:[%s2748_s0 + $0x1b0] sm:$0xff] }
  0x16   :  { %260 = vmatpush.msrb.mxu1 %v1479_v35  ;;  %1534 = vmatpush.msk.msra.mxu2 %vm61_vm0, %v1524_v36  ;;  %v1549_v0 = vld [vmem:[%s2748_s0 + $0x1b8] sm:$0xff]  ;;  %v1546_v1 = vld [vmem:[%s2748_s0 + $0x1a0] sm:$0xff]  ;;  %v1547_v2 = vld [vmem:[%s2748_s0 + $0x1a8] sm:$0xff] }
  0x17   :  { %1538 = vmatpush.msk.msra.mxu3 %vm61_vm0, %v1525_v37  ;;  %1526 = vmatpush.msk.msra.mxu0 %vm61_vm0, %v1522_v38  ;;  %v1544_v3 = vld [vmem:[%s2748_s0 + $0x190] sm:$0xff]  ;;  %v1545_v4 = vld [vmem:[%s2748_s0 + $0x198] sm:$0xff]  ;;  %v1542_v5 = vld [vmem:[%s2748_s0 + $0x180] sm:$0xff] }
  0x18   :  { %1530 = vmatpush.msk.msra.mxu1 %vm61_vm0, %v1523_v39  ;;  %441 = vmatpush.msra.mxu2 %v1520_v40  ;;  %v1543_v6 = vld [vmem:[%s2748_s0 + $0x188] sm:$0xff]  ;;  %v1588_v7 = vld [vmem:[%s2748_s0 + $0x270] sm:$0x1]  ;;  %v1589_v8 = vld [vmem:[%s2748_s0 + $0x278] sm:$0x1] }
  0x19   :  { %43 = vperm.xlu0 %1735, %v18_v41   ;;  %467 = vmatpush.msra.mxu3 %v1521_v42  ;;  %v1586_v9 = vld [vmem:[%s2748_s0 + $0x260] sm:$0x1]  ;;  %v1587_v10 = vld [vmem:[%s2748_s0 + $0x268] sm:$0x1]  ;;  %v1584_v11 = vld [vmem:[%s2748_s0 + $0x250] sm:$0xff] }
  0x1a   :  { %1465 = vmatmul.msk.f32.gmra.mxu0 %vm51_vm1, %v1916_v43  ;;  %1469 = vmatmul.msk.f32.gmra.mxu1 %vm51_vm1, %v1916_v43  ;;  %v1585_v12 = vld [vmem:[%s2748_s0 + $0x258] sm:$0xff]  ;;  %v1582_v13 = vld [vmem:[%s2748_s0 + $0x240] sm:$0xff]  ;;  %v1583_v14 = vld [vmem:[%s2748_s0 + $0x248] sm:$0xff] }
  0x1b   :  { %1473 = vmatmul.msk.f32.gmra.mxu2 %vm51_vm1, %v1916_v43  ;;  %1477 = vmatmul.msk.f32.gmra.mxu3 %vm51_vm1, %v1916_v43  ;;  %v1580_v15 = vld [vmem:[%s2748_s0 + $0x230] sm:$0xff]  ;;  %v1581_v16 = vld [vmem:[%s2748_s0 + $0x238] sm:$0xff]  ;;  %v1578_v18 = vld [vmem:[%s2748_s0 + $0x220] sm:$0xff] }
  0x1c   :  { %48 = vperm.xlu1 %1736, %v19_v44   ;;  %389 = vmatpush.msra.mxu0 %v1518_v45  ;;  %v1579_v19 = vld [vmem:[%s2748_s0 + $0x228] sm:$0xff]  ;;  %v1576_v20 = vld [vmem:[%s2748_s0 + $0x210] sm:$0xff]  ;;  %v1577_v21 = vld [vmem:[%s2748_s0 + $0x218] sm:$0xff] }
  0x1d   :  { %415 = vmatpush.msra.mxu1 %v1519_v46  ;;  %442 = vmatpush.msra.mxu2 %v1516_v47  ;;  %v1574_v22 = vld [vmem:[%s2748_s0 + $0x200] sm:$0xff]  ;;  %v1575_v23 = vld [vmem:[%s2748_s0 + $0x208] sm:$0xff]  ;;  %v1620_v24 = vld [vmem:[%s2748_s0 + $0x2f0] sm:$0x1] }
  0x1e   :  { %468 = vmatpush.msra.mxu3 %v1517_v48  ;;  %390 = vmatpush.msra.mxu0 %v1514_v49  ;;  %v1621_v25 = vld [vmem:[%s2748_s0 + $0x2f8] sm:$0x1]  ;;  %v1618_v26 = vld [vmem:[%s2748_s0 + $0x2e0] sm:$0x1]  ;;  %v1619_v27 = vld [vmem:[%s2748_s0 + $0x2e8] sm:$0x1] }
  0x1f   :  { %416 = vmatpush.msra.mxu1 %v1515_v50  ;;  %443 = vmatpush.msra.mxu2 %v1512_v51  ;;  %v1616_v28 = vld [vmem:[%s2748_s0 + $0x2d0] sm:$0xff]  ;;  %v1617_v29 = vld [vmem:[%s2748_s0 + $0x2d8] sm:$0xff]  ;;  %v1614_v31 = vld [vmem:[%s2748_s0 + $0x2c0] sm:$0xff] }
  0x20   :  { %469 = vmatpush.msra.mxu3 %v1513_v52  ;;  %391 = vmatpush.msra.mxu0 %v1510_v53  ;;  %v1615_v32 = vld [vmem:[%s2748_s0 + $0x2c8] sm:$0xff]  ;;  %v1612_v33 = vld [vmem:[%s2748_s0 + $0x2b0] sm:$0xff]  ;;  %v1613_v34 = vld [vmem:[%s2748_s0 + $0x2b8] sm:$0xff] }
  0x21   :  { %417 = vmatpush.msra.mxu1 %v1511_v54  ;;  %v1610_v35 = vld [vmem:[%s2748_s0 + $0x2a0] sm:$0xff]  ;;  %v1611_v36 = vld [vmem:[%s2748_s0 + $0x2a8] sm:$0xff]  ;;  %v1608_v37 = vld [vmem:[%s2748_s0 + $0x290] sm:$0xff] }
  0x22   :  { %1495 = vmatmul.msk.f32.vlgmr.msrb.gmra.mxu0 %vm51_vm1, %v1813_v17  ;;  %1499 = vmatmul.msk.f32.vlgmr.msrb.gmra.mxu1 %vm51_vm1, %v1813_v17  ;;  %v1609_v38 = vld [vmem:[%s2748_s0 + $0x298] sm:$0xff]  ;;  %v1606_v39 = vld [vmem:[%s2748_s0 + $0x280] sm:$0xff]  ;;  %v1607_v40 = vld [vmem:[%s2748_s0 + $0x288] sm:$0xff] }
  0x23   :  { %1503 = vmatmul.msk.f32.vlgmr.msrb.gmra.mxu2 %vm51_vm1, %v1813_v17  ;;  %1507 = vmatmul.msk.f32.vlgmr.msrb.gmra.mxu3 %vm51_vm1, %v1813_v17  ;;  %v1652_v41 = vld [vmem:[%s2748_s0 + $0x370] sm:$0x1]  ;;  %v1653_v42 = vld [vmem:[%s2748_s0 + $0x378] sm:$0x1]  ;;  %v1650_v44 = vld [vmem:[%s2748_s0 + $0x360] sm:$0x1] }
  0x24   :  { %1566 = vmatpush.msk.msrb.mxu2 %vm61_vm0, %v1556_v55  ;;  %1570 = vmatpush.msk.msrb.mxu3 %vm61_vm0, %v1557_v56  ;;  %v1651_v45 = vld [vmem:[%s2748_s0 + $0x368] sm:$0x1]  ;;  %v1648_v46 = vld [vmem:[%s2748_s0 + $0x350] sm:$0xff]  ;;  %v1649_v47 = vld [vmem:[%s2748_s0 + $0x358] sm:$0xff] }
  0x25   :  { %1558 = vmatpush.msk.msrb.mxu0 %vm61_vm0, %v1554_v57  ;;  %1562 = vmatpush.msk.msrb.mxu1 %vm61_vm0, %v1555_v58  ;;  %v1646_v48 = vld [vmem:[%s2748_s0 + $0x340] sm:$0xff]  ;;  %v1647_v49 = vld [vmem:[%s2748_s0 + $0x348] sm:$0xff]  ;;  %v1644_v50 = vld [vmem:[%s2748_s0 + $0x330] sm:$0xff] }
  0x26   :  { %598 = vmatpush.msrb.mxu2 %v1552_v59  ;;  %624 = vmatpush.msrb.mxu3 %v1553_v60  ;;  %v1645_v51 = vld [vmem:[%s2748_s0 + $0x338] sm:$0xff]  ;;  %v1642_v52 = vld [vmem:[%s2748_s0 + $0x320] sm:$0xff]  ;;  %v1643_v53 = vld [vmem:[%s2748_s0 + $0x328] sm:$0xff] }
  0x27   :  { %546 = vmatpush.msrb.mxu0 %v1550_v61  ;;  %572 = vmatpush.msrb.mxu1 %v1551_v62  ;;  %v1640_v54 = vld [vmem:[%s2748_s0 + $0x310] sm:$0xff]  ;;  %v1641_v55 = vld [vmem:[%s2748_s0 + $0x318] sm:$0xff]  ;;  %v1638_v56 = vld [vmem:[%s2748_s0 + $0x300] sm:$0xff] }
  0x28   :  { %599 = vmatpush.msrb.mxu2 %v1548_v63  ;;  %625 = vmatpush.msrb.mxu3 %v1549_v0  ;;  %v1639_v57 = vld [vmem:[%s2748_s0 + $0x308] sm:$0xff]  ;;  %v1684_v58 = vld [vmem:[%s2748_s0 + $0x3f0] sm:$0x1]  ;;  %v1685_v59 = vld [vmem:[%s2748_s0 + $0x3f8] sm:$0x1] }
  0x29   :  { %547 = vmatpush.msrb.mxu0 %v1546_v1  ;;  %573 = vmatpush.msrb.mxu1 %v1547_v2  ;;  %v1682_v60 = vld [vmem:[%s2748_s0 + $0x3e0] sm:$0x1]  ;;  %v1683_v61 = vld [vmem:[%s2748_s0 + $0x3e8] sm:$0x1]  ;;  %v1680_v62 = vld [vmem:[%s2748_s0 + $0x3d0] sm:$0xff] }
  0x2a   :  { %1496 = vmatmul.msk.f32.gmra.mxu0 %vm51_vm1, %v1866_v30  ;;  %1500 = vmatmul.msk.f32.gmra.mxu1 %vm51_vm1, %v1866_v30  ;;  %v1681_v63 = vld [vmem:[%s2748_s0 + $0x3d8] sm:$0xff]  ;;  %v1678_v2 = vld [vmem:[%s2748_s0 + $0x3c0] sm:$0xff] }
  0x2b   :  { %1504 = vmatmul.msk.f32.gmra.mxu2 %vm51_vm1, %v1866_v30  ;;  %1508 = vmatmul.msk.f32.gmra.mxu3 %vm51_vm1, %v1866_v30 }
  0x2c   :  { %600 = vmatpush.msrb.mxu2 %v1544_v3  ;;  %626 = vmatpush.msrb.mxu3 %v1545_v4  ;;  %v1679_v3 = vld [vmem:[%s2748_s0 + $0x3c8] sm:$0xff]  ;;  %v1676_v4 = vld [vmem:[%s2748_s0 + $0x3b0] sm:$0xff] }
  0x2d   :  { %548 = vmatpush.msrb.mxu0 %v1542_v5  ;;  %574 = vmatpush.msrb.mxu1 %v1543_v6  ;;  %v1677_v5 = vld [vmem:[%s2748_s0 + $0x3b8] sm:$0xff]  ;;  %v1674_v6 = vld [vmem:[%s2748_s0 + $0x3a0] sm:$0xff] }
  0x32   :  { %1497 = vmatmul.msk.f32.gmra.mxu0 %vm51_vm1, %v1916_v43  ;;  %1501 = vmatmul.msk.f32.gmra.mxu1 %vm51_vm1, %v1916_v43 }
  0x33   :  { %1505 = vmatmul.msk.f32.gmra.mxu2 %vm51_vm1, %v1916_v43  ;;  %1509 = vmatmul.msk.f32.gmra.mxu3 %vm51_vm1, %v1916_v43 }
  0x3a   :  { %1527 = vmatmul.msk.f32.vlgmr.msra.gmra.mxu0 %vm51_vm1, %v1813_v17  ;;  %1531 = vmatmul.msk.f32.vlgmr.msra.gmra.mxu1 %vm51_vm1, %v1813_v17 }
  0x3b   :  { %1535 = vmatmul.msk.f32.vlgmr.msra.gmra.mxu2 %vm51_vm1, %v1813_v17  ;;  %1539 = vmatmul.msk.f32.vlgmr.msra.gmra.mxu3 %vm51_vm1, %v1813_v17 }
  0x3c   :  { %1598 = vmatpush.msk.msra.mxu2 %vm61_vm0, %v1588_v7  ;;  %1602 = vmatpush.msk.msra.mxu3 %vm61_vm0, %v1589_v8  ;;  %v1675_v7 = vld [vmem:[%s2748_s0 + $0x3a8] sm:$0xff]  ;;  %v1672_v8 = vld [vmem:[%s2748_s0 + $0x390] sm:$0xff] }
  0x3d   :  { %1590 = vmatpush.msk.msra.mxu0 %vm61_vm0, %v1586_v9  ;;  %1594 = vmatpush.msk.msra.mxu1 %vm61_vm0, %v1587_v10  ;;  %v1673_v9 = vld [vmem:[%s2748_s0 + $0x398] sm:$0xff] }
  0x3e   :  { %755 = vmatpush.msra.mxu2 %v1584_v11  ;;  %781 = vmatpush.msra.mxu3 %v1585_v12 }
  0x3f   :  { %703 = vmatpush.msra.mxu0 %v1582_v13  ;;  %729 = vmatpush.msra.mxu1 %v1583_v14  ;;  %v1670_v14 = vld [vmem:[%s2748_s0 + $0x380] sm:$0xff] }
  0x40   :  { %756 = vmatpush.msra.mxu2 %v1580_v15  ;;  %782 = vmatpush.msra.mxu3 %v1581_v16  ;;  %v1671_v15 = vld [vmem:[%s2748_s0 + $0x388] sm:$0xff] }
  0x41   :  { %704 = vmatpush.msra.mxu0 %v1578_v18  ;;  %730 = vmatpush.msra.mxu1 %v1579_v19 }
  0x42   :  { %1528 = vmatmul.msk.f32.gmra.mxu0 %vm51_vm1, %v1866_v30  ;;  %1532 = vmatmul.msk.f32.gmra.mxu1 %vm51_vm1, %v1866_v30 }
  0x43   :  { %1536 = vmatmul.msk.f32.gmra.mxu2 %vm51_vm1, %v1866_v30  ;;  %1540 = vmatmul.msk.f32.gmra.mxu3 %vm51_vm1, %v1866_v30 }
  0x44   :  { %757 = vmatpush.msra.mxu2 %v1576_v20  ;;  %783 = vmatpush.msra.mxu3 %v1577_v21  ;;  %v1716_v21 = vld [vmem:[%s2748_s0 + $0x470] sm:$0x1] }
  0x45   :  { %705 = vmatpush.msra.mxu0 %v1574_v22  ;;  %731 = vmatpush.msra.mxu1 %v1575_v23  ;;  %v1717_v22 = vld [vmem:[%s2748_s0 + $0x478] sm:$0x1]  ;;  %v1714_v23 = vld [vmem:[%s2748_s0 + $0x460] sm:$0x1] }
  0x4a   :  { %1529 = vmatmul.msk.f32.gmra.mxu0 %vm51_vm1, %v1916_v43  ;;  %1533 = vmatmul.msk.f32.gmra.mxu1 %vm51_vm1, %v1916_v43 }
  0x4b   :  { %1537 = vmatmul.msk.f32.gmra.mxu2 %vm51_vm1, %v1916_v43  ;;  %1541 = vmatmul.msk.f32.gmra.mxu3 %vm51_vm1, %v1916_v43 }
  0x52   :  { %1559 = vmatmul.msk.f32.vlgmr.msrb.gmra.mxu0 %vm51_vm1, %v1813_v17  ;;  %1563 = vmatmul.msk.f32.vlgmr.msrb.gmra.mxu1 %vm51_vm1, %v1813_v17 }
  0x53   :  { %1567 = vmatmul.msk.f32.vlgmr.msrb.gmra.mxu2 %vm51_vm1, %v1813_v17  ;;  %1571 = vmatmul.msk.f32.vlgmr.msrb.gmra.mxu3 %vm51_vm1, %v1813_v17 }
  0x54   :  { %1630 = vmatpush.msk.msrb.mxu2 %vm61_vm0, %v1620_v24  ;;  %1634 = vmatpush.msk.msrb.mxu3 %vm61_vm0, %v1621_v25  ;;  %v1715_v24 = vld [vmem:[%s2748_s0 + $0x468] sm:$0x1]  ;;  %v1712_v25 = vld [vmem:[%s2748_s0 + $0x450] sm:$0xff] }
  0x55   :  { %1622 = vmatpush.msk.msrb.mxu0 %vm61_vm0, %v1618_v26  ;;  %1626 = vmatpush.msk.msrb.mxu1 %vm61_vm0, %v1619_v27  ;;  %v1713_v26 = vld [vmem:[%s2748_s0 + $0x458] sm:$0xff] }
  0x56   :  { %912 = vmatpush.msrb.mxu2 %v1616_v28  ;;  %938 = vmatpush.msrb.mxu3 %v1617_v29 }
  0x57   :  { %860 = vmatpush.msrb.mxu0 %v1614_v31  ;;  %886 = vmatpush.msrb.mxu1 %v1615_v32 }
  0x58   :  { %913 = vmatpush.msrb.mxu2 %v1612_v33  ;;  %939 = vmatpush.msrb.mxu3 %v1613_v34  ;;  %v1710_v33 = vld [vmem:[%s2748_s0 + $0x440] sm:$0xff]  ;;  %v1711_v34 = vld [vmem:[%s2748_s0 + $0x448] sm:$0xff] }
  0x59   :  { %861 = vmatpush.msrb.mxu0 %v1610_v35  ;;  %887 = vmatpush.msrb.mxu1 %v1611_v36  ;;  %v1708_v35 = vld [vmem:[%s2748_s0 + $0x430] sm:$0xff]  ;;  %v1709_v36 = vld [vmem:[%s2748_s0 + $0x438] sm:$0xff] }
  0x5a   :  { %1560 = vmatmul.msk.f32.gmra.mxu0 %vm51_vm1, %v1866_v30  ;;  %1564 = vmatmul.msk.f32.gmra.mxu1 %vm51_vm1, %v1866_v30 }
  0x5b   :  { %1568 = vmatmul.msk.f32.gmra.mxu2 %vm51_vm1, %v1866_v30  ;;  %1572 = vmatmul.msk.f32.gmra.mxu3 %vm51_vm1, %v1866_v30 }
  0x5c   :  { %914 = vmatpush.msrb.mxu2 %v1608_v37  ;;  %940 = vmatpush.msrb.mxu3 %v1609_v38  ;;  %v1706_v37 = vld [vmem:[%s2748_s0 + $0x420] sm:$0xff]  ;;  %v1707_v38 = vld [vmem:[%s2748_s0 + $0x428] sm:$0xff] }
  0x5d   :  { %862 = vmatpush.msrb.mxu0 %v1606_v39  ;;  %888 = vmatpush.msrb.mxu1 %v1607_v40 }
  0x62   :  { %1561 = vmatmul.msk.f32.gmra.mxu0 %vm51_vm1, %v1916_v43  ;;  %1565 = vmatmul.msk.f32.gmra.mxu1 %vm51_vm1, %v1916_v43 }
  0x63   :  { %1569 = vmatmul.msk.f32.gmra.mxu2 %vm51_vm1, %v1916_v43  ;;  %1573 = vmatmul.msk.f32.gmra.mxu3 %vm51_vm1, %v1916_v43 }
  0x6a   :  { %1591 = vmatmul.msk.f32.vlgmr.msra.gmra.mxu0 %vm51_vm1, %v1813_v17  ;;  %1595 = vmatmul.msk.f32.vlgmr.msra.gmra.mxu1 %vm51_vm1, %v1813_v17 }
  0x6b   :  { %1599 = vmatmul.msk.f32.vlgmr.msra.gmra.mxu2 %vm51_vm1, %v1813_v17  ;;  %1603 = vmatmul.msk.f32.vlgmr.msra.gmra.mxu3 %vm51_vm1, %v1813_v17 }
  0x6c   :  { %1662 = vmatpush.msk.msra.mxu2 %vm61_vm0, %v1652_v41  ;;  %1666 = vmatpush.msk.msra.mxu3 %vm61_vm0, %v1653_v42  ;;  %v1704_v41 = vld [vmem:[%s2748_s0 + $0x410] sm:$0xff]  ;;  %v1705_v42 = vld [vmem:[%s2748_s0 + $0x418] sm:$0xff] }
  0x6d   :  { %1654 = vmatpush.msk.msra.mxu0 %vm61_vm0, %v1650_v44  ;;  %1658 = vmatpush.msk.msra.mxu1 %vm61_vm0, %v1651_v45 }
  0x6e   :  { %1069 = vmatpush.msra.mxu2 %v1648_v46  ;;  %1095 = vmatpush.msra.mxu3 %v1649_v47 }
  0x6f   :  { %1017 = vmatpush.msra.mxu0 %v1646_v48  ;;  %1043 = vmatpush.msra.mxu1 %v1647_v49 }
  0x70   :  { %1070 = vmatpush.msra.mxu2 %v1644_v50  ;;  %1096 = vmatpush.msra.mxu3 %v1645_v51 }
  0x71   :  { %1018 = vmatpush.msra.mxu0 %v1642_v52  ;;  %1044 = vmatpush.msra.mxu1 %v1643_v53 }
  0x72   :  { %1592 = vmatmul.msk.f32.gmra.mxu0 %vm51_vm1, %v1866_v30  ;;  %1596 = vmatmul.msk.f32.gmra.mxu1 %vm51_vm1, %v1866_v30 }
  0x73   :  { %1600 = vmatmul.msk.f32.gmra.mxu2 %vm51_vm1, %v1866_v30  ;;  %1604 = vmatmul.msk.f32.gmra.mxu3 %vm51_vm1, %v1866_v30 }
  0x74   :  { %1071 = vmatpush.msra.mxu2 %v1640_v54  ;;  %1097 = vmatpush.msra.mxu3 %v1641_v55  ;;  %v1702_v54 = vld [vmem:[%s2748_s0 + $0x400] sm:$0xff]  ;;  %v1703_v55 = vld [vmem:[%s2748_s0 + $0x408] sm:$0xff] }
  0x75   :  { %1019 = vmatpush.msra.mxu0 %v1638_v56  ;;  %1045 = vmatpush.msra.mxu1 %v1639_v57 }
  0x7a   :  { %1593 = vmatmul.msk.f32.gmra.mxu0 %vm51_vm1, %v1916_v43  ;;  %1597 = vmatmul.msk.f32.gmra.mxu1 %vm51_vm1, %v1916_v43 }
  0x7b   :  { %1601 = vmatmul.msk.f32.gmra.mxu2 %vm51_vm1, %v1916_v43  ;;  %1605 = vmatmul.msk.f32.gmra.mxu3 %vm51_vm1, %v1916_v43 }
  0x82   :  { %1623 = vmatmul.msk.f32.vlgmr.msrb.gmra.mxu0 %vm51_vm1, %v1813_v17  ;;  %1627 = vmatmul.msk.f32.vlgmr.msrb.gmra.mxu1 %vm51_vm1, %v1813_v17 }
  0x83   :  { %1631 = vmatmul.msk.f32.vlgmr.msrb.gmra.mxu2 %vm51_vm1, %v1813_v17  ;;  %1635 = vmatmul.msk.f32.vlgmr.msrb.gmra.mxu3 %vm51_vm1, %v1813_v17  ;;  %v2392_v32 = vpop.permute.xlu0 %38 }
  0x84   :  { %1694 = vmatpush.msk.msrb.mxu2 %vm61_vm0, %v1684_v58  ;;  %1698 = vmatpush.msk.msrb.mxu3 %vm61_vm0, %v1685_v59 }
  0x85   :  { %1686 = vmatpush.msk.msrb.mxu0 %vm61_vm0, %v1682_v60  ;;  %1690 = vmatpush.msk.msrb.mxu1 %vm61_vm0, %v1683_v61 }
  0x86   :  { %1226 = vmatpush.msrb.mxu2 %v1680_v62  ;;  %1252 = vmatpush.msrb.mxu3 %v1681_v63 }
  0x87   :  { %v2296_v0 = vpop.f32.mrf.mxu0  ;;  %v2298_v1 = vpop.f32.mrf.mxu1  ;;  %1174 = vmatpush.msrb.mxu0 %v1678_v2  ;;  %1200 = vmatpush.msrb.mxu1 %v1679_v3 }
  0x88   :  { %1227 = vmatpush.msrb.mxu2 %v1676_v4  ;;  %1253 = vmatpush.msrb.mxu3 %v1677_v5 }
  0x89   :  { %1175 = vmatpush.msrb.mxu0 %v1674_v6  ;;  %1201 = vmatpush.msrb.mxu1 %v1675_v7 }
  0x8a   :  { %1624 = vmatmul.msk.f32.gmra.mxu0 %vm51_vm1, %v1866_v30  ;;  %1628 = vmatmul.msk.f32.gmra.mxu1 %vm51_vm1, %v1866_v30 }
  0x8b   :  { %1632 = vmatmul.msk.f32.gmra.mxu2 %vm51_vm1, %v1866_v30  ;;  %1636 = vmatmul.msk.f32.gmra.mxu3 %vm51_vm1, %v1866_v30  ;;  %v2436_v56 = vpop.permute.xlu0 %43 }
  0x8c   :  { %1228 = vmatpush.msrb.mxu2 %v1672_v8  ;;  %1254 = vmatpush.msrb.mxu3 %v1673_v9 }
  0x8d   :  { %1176 = vmatpush.msrb.mxu0 %v1670_v14  ;;  %1202 = vmatpush.msrb.mxu1 %v1671_v15  ;;  %v118_v15 = vadd.f32 %v2298_v1, %v2392_v32 }
  0x8e   :  { %v143_v10 = vpop.f32.mrf.mxu2  ;;  %v169_v11 = vpop.f32.mrf.mxu3 }
  0x8f   :  { %v2332_v12 = vpop.f32.mrf.mxu0  ;;  %v2334_v13 = vpop.f32.mrf.mxu1  ;;  %v144_v39 = vadd.f32 %v143_v10, %v2392_v32  ;;  %v170_v40 = vadd.f32 %v169_v11, %v2392_v32  ;;  %v92_v10 = vadd.f32 %v2296_v0, %v2392_v32 }
  0x90   :  { %v2460_v7 = vpop.permute.xlu1 %48 }
  0x91   :  { %v180_v50 = vmax.f32 %v144_v39, 0.0  ;;  %v181_v51 = vmax.f32 %v170_v40, 0.0 }
  0x92   :  { %1625 = vmatmul.msk.f32.gmra.mxu0 %vm51_vm1, %v1916_v43  ;;  %1629 = vmatmul.msk.f32.gmra.mxu1 %vm51_vm1, %v1916_v43 }
  0x93   :  { %1633 = vmatmul.msk.f32.gmra.mxu2 %vm51_vm1, %v1916_v43  ;;  %1637 = vmatmul.msk.f32.gmra.mxu3 %vm51_vm1, %v1916_v43 }
  0x96   :  { %v2350_v16 = vpop.f32.mrf.mxu2  ;;  %v2352_v18 = vpop.f32.mrf.mxu3 }
  0x97   :  { %v2354_v19 = vpop.f32.mrf.mxu0  ;;  %v2356_v20 = vpop.f32.mrf.mxu1  ;;  %v147_v59 = vadd.f32 %v2350_v16, %v2436_v56  ;;  %v173_v60 = vadd.f32 %v2352_v18, %v2436_v56 }
  0x99   :  { %v184_v5 = vmax.f32 %v147_v59, 0.0  ;;  %v185_v6 = vmax.f32 %v173_v60, 0.0 }
  0x9a   :  { %1655 = vmatmul.msk.f32.vlgmr.msra.gmra.mxu0 %vm51_vm1, %v1813_v17  ;;  %1659 = vmatmul.msk.f32.vlgmr.msra.gmra.mxu1 %vm51_vm1, %v1813_v17 }
  0x9b   :  { %1663 = vmatmul.msk.f32.vlgmr.msra.gmra.mxu2 %vm51_vm1, %v1813_v17  ;;  %1667 = vmatmul.msk.f32.vlgmr.msra.gmra.mxu3 %vm51_vm1, %v1813_v17 }
  0x9c   :  { %1726 = vmatpush.msk.msra.mxu2 %vm61_vm0, %v1716_v21  ;;  %1730 = vmatpush.msk.msra.mxu3 %vm61_vm0, %v1717_v22  ;;  %v178_v22 = vmax.f32 %v92_v10, 0.0 }
  0x9d   :  { %1718 = vmatpush.msk.msra.mxu0 %vm61_vm0, %v1714_v23  ;;  %1722 = vmatpush.msk.msra.mxu1 %vm61_vm0, %v1715_v24 }
  0x9e   :  { %v2388_v27 = vpop.f32.mrf.mxu2  ;;  %v2390_v28 = vpop.f32.mrf.mxu3  ;;  %1383 = vmatpush.msra.mxu2 %v1712_v25  ;;  %1409 = vmatpush.msra.mxu3 %v1713_v26  ;;  %v179_v26 = vmax.f32 %v118_v15, 0.0 }
  0x9f   :  { %v236_v29 = vpop.f32.mrf.mxu0  ;;  %v262_v31 = vpop.f32.mrf.mxu1  ;;  %1331 = vmatpush.msra.mxu0 %v1710_v33  ;;  %1357 = vmatpush.msra.mxu1 %v1711_v34  ;;  %v150_v0 = vadd.f32 %v2388_v27, %v2460_v7  ;;  %v176_v21 = vadd.f32 %v2390_v28, %v2460_v7 }
  0xa0   :  { %1384 = vmatpush.msra.mxu2 %v1708_v35  ;;  %1410 = vmatpush.msra.mxu3 %v1709_v36  ;;  %v237_v11 = vadd.f32 %v236_v29, %v2392_v32  ;;  %v263_v14 = vadd.f32 %v262_v31, %v2392_v32  ;;  %v95_v29 = vadd.f32 %v2332_v12, %v2436_v56 }
  0xa1   :  { %1332 = vmatpush.msra.mxu0 %v1706_v37  ;;  %1358 = vmatpush.msra.mxu1 %v1707_v38  ;;  %v188_v36 = vmax.f32 %v150_v0, 0.0  ;;  %v189_v27 = vmax.f32 %v176_v21, 0.0 }
  0xa2   :  { %1656 = vmatmul.msk.f32.gmra.mxu0 %vm51_vm1, %v1866_v30  ;;  %1660 = vmatmul.msk.f32.gmra.mxu1 %vm51_vm1, %v1866_v30  ;;  %v323_v23 = vmax.f32 %v237_v11, 0.0  ;;  %v324_v24 = vmax.f32 %v263_v14, 0.0 }
  0xa3   :  { %1664 = vmatmul.msk.f32.gmra.mxu2 %vm51_vm1, %v1866_v30  ;;  %1668 = vmatmul.msk.f32.gmra.mxu3 %vm51_vm1, %v1866_v30 }
  0xa4   :  { %1385 = vmatpush.msra.mxu2 %v1704_v41  ;;  %1411 = vmatpush.msra.mxu3 %v1705_v42  ;;  %v335_v42 = vmax.f32 %v178_v22, %v323_v23  ;;  %v336_v12 = vmax.f32 %v179_v26, %v324_v24 }
  0xa5   :  { %1333 = vmatpush.msra.mxu0 %v1702_v54  ;;  %1359 = vmatpush.msra.mxu1 %v1703_v55  ;;  %v182_v55 = vmax.f32 %v95_v29, 0.0 }
  0xa6   :  { %v288_v44 = vpop.f32.mrf.mxu2  ;;  %v314_v45 = vpop.f32.mrf.mxu3 }
  0xa7   :  { %v289_v46 = vadd.f32 %v288_v44, %v2392_v32  ;;  %v315_v47 = vadd.f32 %v314_v45, %v2392_v32  ;;  %v239_v48 = vpop.f32.mrf.mxu0  ;;  %v265_v49 = vpop.f32.mrf.mxu1 }
  0xa8   :  { %v240_v38 = vadd.f32 %v239_v48, %v2436_v56  ;;  %v266_v39 = vadd.f32 %v265_v49, %v2436_v56 }
  0xa9   :  { %v325_v52 = vmax.f32 %v289_v46, 0.0  ;;  %v326_v53 = vmax.f32 %v315_v47, 0.0  ;;  %v121_v46 = vadd.f32 %v2334_v13, %v2436_v56 }
  0xaa   :  { %1657 = vmatmul.msk.f32.gmra.mxu0 %vm51_vm1, %v1916_v43  ;;  %1661 = vmatmul.msk.f32.gmra.mxu1 %vm51_vm1, %v1916_v43 }
  0xab   :  { %v2442_v57 = vmax.f32 %v180_v50, %v325_v52  ;;  %v2444_v58 = vmax.f32 %v181_v51, %v326_v53  ;;  %1665 = vmatmul.msk.f32.gmra.mxu2 %vm51_vm1, %v1916_v43  ;;  %1669 = vmatmul.msk.f32.gmra.mxu3 %vm51_vm1, %v1916_v43  ;;  %v327_v51 = vmax.f32 %v240_v38, 0.0  ;;  %v328_v52 = vmax.f32 %v266_v39, 0.0 }
  0xac   :  { %v183_v13 = vmax.f32 %v121_v46, 0.0 }
  0xae   :  { %v291_v61 = vpop.f32.mrf.mxu2  ;;  %v317_v62 = vpop.f32.mrf.mxu3 }
  0xaf   :  { %v292_v63 = vadd.f32 %v291_v61, %v2436_v56  ;;  %v318_v2 = vadd.f32 %v317_v62, %v2436_v56  ;;  %v2456_v3 = vpop.f32.mrf.mxu0  ;;  %v2458_v4 = vpop.f32.mrf.mxu1 }
  0xb0   :  { %v243_v10 = vadd.f32 %v2456_v3, %v2460_v7  ;;  %v269_v11 = vadd.f32 %v2458_v4, %v2460_v7  ;;  %v98_v3 = vadd.f32 %v2354_v19, %v2460_v7  ;;  %v124_v4 = vadd.f32 %v2356_v20, %v2460_v7 }
  0xb1   :  { %v329_v8 = vmax.f32 %v292_v63, 0.0  ;;  %v330_v9 = vmax.f32 %v318_v2, 0.0 }
  0xb2   :  { %1687 = vmatmul.msk.f32.vlgmr.msrb.gmra.mxu0 %vm51_vm1, %v1813_v17  ;;  %1691 = vmatmul.msk.f32.vlgmr.msrb.gmra.mxu1 %vm51_vm1, %v1813_v17  ;;  %v332_v24 = vmax.f32 %v269_v11, 0.0 }
  0xb3   :  { %v2472_v16 = vmax.f32 %v184_v5, %v329_v8  ;;  %v2474_v18 = vmax.f32 %v185_v6, %v330_v9  ;;  %1695 = vmatmul.msk.f32.vlgmr.msrb.gmra.mxu2 %vm51_vm1, %v1813_v17  ;;  %1699 = vmatmul.msk.f32.vlgmr.msrb.gmra.mxu3 %vm51_vm1, %v1813_v17  ;;  %v339_v5 = vmax.f32 %v182_v55, %v327_v51 }
  0xb4   :  { %v340_v6 = vmax.f32 %v183_v13, %v328_v52 }
  0xb6   :  { %v294_v1 = vpop.f32.mrf.mxu2  ;;  %v320_v25 = vpop.f32.mrf.mxu3 }
  0xb7   :  { %v295_v31 = vadd.f32 %v294_v1, %v2460_v7  ;;  %v321_v33 = vadd.f32 %v320_v25, %v2460_v7  ;;  %v393_v34 = vpop.f32.mrf.mxu0  ;;  %v419_v35 = vpop.f32.mrf.mxu1 }
  0xb8   :  { %v394_v37 = vadd.f32 %v393_v34, %v2392_v32  ;;  %v420_v28 = vadd.f32 %v419_v35, %v2392_v32  ;;  %v187_v34 = vmax.f32 %v124_v4, 0.0 }
  0xb9   :  { %v333_v40 = vmax.f32 %v295_v31, 0.0  ;;  %v334_v41 = vmax.f32 %v321_v33, 0.0  ;;  %v186_v33 = vmax.f32 %v98_v3, 0.0 }
  0xba   :  { %v480_v44 = vmax.f32 %v394_v37, 0.0  ;;  %v481_v45 = vmax.f32 %v420_v28, 0.0  ;;  %1688 = vmatmul.msk.f32.gmra.mxu0 %vm51_vm1, %v1866_v30  ;;  %1692 = vmatmul.msk.f32.gmra.mxu1 %vm51_vm1, %v1866_v30  ;;  %v344_v37 = vmax.f32 %v187_v34, %v332_v24 }
  0xbb   :  { %v2498_v47 = vmax.f32 %v188_v36, %v333_v40  ;;  %v2500_v48 = vmax.f32 %v189_v27, %v334_v41  ;;  %1696 = vmatmul.msk.f32.gmra.mxu2 %vm51_vm1, %v1866_v30  ;;  %1700 = vmatmul.msk.f32.gmra.mxu3 %vm51_vm1, %v1866_v30 }
  0xbc   :  { %v2506_v49 = vmax.f32 %v335_v42, %v480_v44  ;;  %v2508_v50 = vmax.f32 %v336_v12, %v481_v45 }
  0xbe   :  { %v445_v53 = vpop.f32.mrf.mxu2  ;;  %v471_v54 = vpop.f32.mrf.mxu3 }
  0xbf   :  { %v446_v59 = vadd.f32 %v445_v53, %v2392_v32  ;;  %v472_v60 = vadd.f32 %v471_v54, %v2392_v32  ;;  %v396_v61 = vpop.f32.mrf.mxu0  ;;  %v422_v62 = vpop.f32.mrf.mxu1 }
  0xc0   :  { %v397_v63 = vadd.f32 %v396_v61, %v2436_v56  ;;  %v423_v2 = vadd.f32 %v422_v62, %v2436_v56 }
  0xc1   :  { %v482_v8 = vmax.f32 %v446_v59, 0.0  ;;  %v483_v9 = vmax.f32 %v472_v60, 0.0 }
  0xc2   :  { %v484_v14 = vmax.f32 %v397_v63, 0.0  ;;  %v485_v15 = vmax.f32 %v423_v2, 0.0  ;;  %1689 = vmatmul.msk.f32.gmra.mxu0 %vm51_vm1, %v1916_v43  ;;  %1693 = vmatmul.msk.f32.gmra.mxu1 %vm51_vm1, %v1916_v43 }
  0xc3   :  { %v2523_v0 = vmax.f32 %v2442_v57, %v482_v8  ;;  %v2526_v21 = vmax.f32 %v2444_v58, %v483_v9  ;;  %1697 = vmatmul.msk.f32.gmra.mxu2 %vm51_vm1, %v1916_v43  ;;  %1701 = vmatmul.msk.f32.gmra.mxu3 %vm51_vm1, %v1916_v43  ;;  %v331_v57 = vmax.f32 %v243_v10, 0.0 }
  0xc4   :  { %v2536_v22 = vmax.f32 %v339_v5, %v484_v14  ;;  %v2538_v23 = vmax.f32 %v340_v6, %v485_v15 }
  0xc5   :  { %v343_v27 = vmax.f32 %v186_v33, %v331_v57 }
  0xc6   :  { %v448_v58 = vpop.f32.mrf.mxu2  ;;  %v474_v1 = vpop.f32.mrf.mxu3 }
  0xc7   :  { %v449_v25 = vadd.f32 %v448_v58, %v2436_v56  ;;  %v475_v26 = vadd.f32 %v474_v1, %v2436_v56  ;;  %v399_v29 = vpop.f32.mrf.mxu0  ;;  %v425_v31 = vpop.f32.mrf.mxu1 }
  0xc8   :  { %v400_v19 = vadd.f32 %v399_v29, %v2460_v7  ;;  %v426_v20 = vadd.f32 %v425_v31, %v2460_v7 }
  0xc9   :  { %v486_v35 = vmax.f32 %v449_v25, 0.0  ;;  %v487_v36 = vmax.f32 %v475_v26, 0.0 }
  0xca   :  { %v488_v28 = vmax.f32 %v400_v19, 0.0  ;;  %v489_v38 = vmax.f32 %v426_v20, 0.0  ;;  %1719 = vmatmul.msk.f32.vlgmr.msra.gmra.mxu0 %vm51_vm1, %v1813_v17  ;;  %1723 = vmatmul.msk.f32.vlgmr.msra.gmra.mxu1 %vm51_vm1, %v1813_v17 }
  0xcb   :  { %v498_v39 = vmax.f32 %v2472_v16, %v486_v35  ;;  %v499_v40 = vmax.f32 %v2474_v18, %v487_v36  ;;  %1727 = vmatmul.msk.f32.vlgmr.msra.gmra.mxu2 %vm51_vm1, %v1813_v17  ;;  %1731 = vmatmul.msk.f32.vlgmr.msra.gmra.mxu3 %vm51_vm1, %v1813_v17 }
  0xcc   :  { %v500_v41 = vmax.f32 %v343_v27, %v488_v28  ;;  %v501_v42 = vmax.f32 %v344_v37, %v489_v38 }
  0xce   :  { %v451_v12 = vpop.f32.mrf.mxu2  ;;  %v477_v44 = vpop.f32.mrf.mxu3 }
  0xcf   :  { %v452_v45 = vadd.f32 %v451_v12, %v2460_v7  ;;  %v478_v46 = vadd.f32 %v477_v44, %v2460_v7  ;;  %v550_v51 = vpop.f32.mrf.mxu0  ;;  %v576_v52 = vpop.f32.mrf.mxu1 }
  0xd0   :  { %v551_v16 = vadd.f32 %v550_v51, %v2392_v32  ;;  %v577_v18 = vadd.f32 %v576_v52, %v2392_v32 }
  0xd1   :  { %v490_v53 = vmax.f32 %v452_v45, 0.0  ;;  %v491_v54 = vmax.f32 %v478_v46, 0.0 }
  0xd2   :  { %v637_v55 = vmax.f32 %v551_v16, 0.0  ;;  %v638_v13 = vmax.f32 %v577_v18, 0.0  ;;  %1720 = vmatmul.msk.f32.gmra.mxu0 %vm51_vm1, %v1866_v30  ;;  %1724 = vmatmul.msk.f32.gmra.mxu1 %vm51_vm1, %v1866_v30 }
  0xd3   :  { %v502_v17 = vmax.f32 %v2498_v47, %v490_v53  ;;  %v503_v59 = vmax.f32 %v2500_v48, %v491_v54  ;;  %1728 = vmatmul.msk.f32.gmra.mxu2 %vm51_vm1, %v1866_v30  ;;  %1732 = vmatmul.msk.f32.gmra.mxu3 %vm51_vm1, %v1866_v30 }
  0xd4   :  { %v649_v60 = vmax.f32 %v2506_v49, %v637_v55  ;;  %v650_v61 = vmax.f32 %v2508_v50, %v638_v13 }
  0xd6   :  { %v602_v62 = vpop.f32.mrf.mxu2  ;;  %v628_v63 = vpop.f32.mrf.mxu3 }
  0xd7   :  { %v603_v2 = vadd.f32 %v602_v62, %v2392_v32  ;;  %v629_v5 = vadd.f32 %v628_v63, %v2392_v32  ;;  %v553_v6 = vpop.f32.mrf.mxu0  ;;  %v579_v47 = vpop.f32.mrf.mxu1 }
  0xd8   :  { %v554_v48 = vadd.f32 %v553_v6, %v2436_v56  ;;  %v580_v8 = vadd.f32 %v579_v47, %v2436_v56 }
  0xd9   :  { %v639_v9 = vmax.f32 %v603_v2, 0.0  ;;  %v640_v10 = vmax.f32 %v629_v5, 0.0 }
  0xda   :  { %v641_v11 = vmax.f32 %v554_v48, 0.0  ;;  %v642_v30 = vmax.f32 %v580_v8, 0.0  ;;  %1721 = vmatmul.msk.f32.gmra.mxu0 %vm51_vm1, %v1916_v43  ;;  %1725 = vmatmul.msk.f32.gmra.mxu1 %vm51_vm1, %v1916_v43 }
  0xdb   :  { %v651_v49 = vmax.f32 %v2523_v0, %v639_v9  ;;  %v652_v50 = vmax.f32 %v2526_v21, %v640_v10  ;;  %1729 = vmatmul.msk.f32.gmra.mxu2 %vm51_vm1, %v1916_v43  ;;  %1733 = vmatmul.msk.f32.gmra.mxu3 %vm51_vm1, %v1916_v43 }
  0xdc   :  { %v653_v14 = vmax.f32 %v2536_v22, %v641_v11  ;;  %v654_v15 = vmax.f32 %v2538_v23, %v642_v30 }
  0xde   :  { %v605_v3 = vpop.f32.mrf.mxu2  ;;  %v631_v4 = vpop.f32.mrf.mxu3 }
  0xdf   :  { %v606_v57 = vadd.f32 %v605_v3, %v2436_v56  ;;  %v632_v24 = vadd.f32 %v631_v4, %v2436_v56  ;;  %v556_v58 = vpop.f32.mrf.mxu0  ;;  %v582_v0 = vpop.f32.mrf.mxu1 }
  0xe0   :  { %v557_v21 = vadd.f32 %v556_v58, %v2460_v7  ;;  %v583_v1 = vadd.f32 %v582_v0, %v2460_v7 }
  0xe1   :  { %v643_v25 = vmax.f32 %v606_v57, 0.0  ;;  %v644_v26 = vmax.f32 %v632_v24, 0.0 }
  0xe2   :  { %v645_v29 = vmax.f32 %v557_v21, 0.0  ;;  %v646_v43 = vmax.f32 %v583_v1, 0.0 }
  0xe3   :  { %v655_v31 = vmax.f32 %v498_v39, %v643_v25  ;;  %v656_v22 = vmax.f32 %v499_v40, %v644_v26 }
  0xe4   :  { %v657_v33 = vmax.f32 %v500_v41, %v645_v29  ;;  %v658_v23 = vmax.f32 %v501_v42, %v646_v43 }
  0xe6   :  { %v608_v34 = vpop.f32.mrf.mxu2  ;;  %v634_v19 = vpop.f32.mrf.mxu3 }
  0xe7   :  { %v609_v20 = vadd.f32 %v608_v34, %v2460_v7  ;;  %v635_v35 = vadd.f32 %v634_v19, %v2460_v7  ;;  %v707_v36 = vpop.f32.mrf.mxu0  ;;  %v733_v27 = vpop.f32.mrf.mxu1 }
  0xe8   :  { %v708_v37 = vadd.f32 %v707_v36, %v2392_v32  ;;  %v734_v28 = vadd.f32 %v733_v27, %v2392_v32 }
  0xe9   :  { %v647_v38 = vmax.f32 %v609_v20, 0.0  ;;  %v648_v12 = vmax.f32 %v635_v35, 0.0 }
  0xea   :  { %v794_v44 = vmax.f32 %v708_v37, 0.0  ;;  %v795_v45 = vmax.f32 %v734_v28, 0.0 }
  0xeb   :  { %v659_v39 = vmax.f32 %v502_v17, %v647_v38  ;;  %v660_v40 = vmax.f32 %v503_v59, %v648_v12 }
  0xec   :  { %v806_v41 = vmax.f32 %v649_v60, %v794_v44  ;;  %v807_v42 = vmax.f32 %v650_v61, %v795_v45 }
  0xee   :  { %v759_v46 = vpop.f32.mrf.mxu2  ;;  %v785_v51 = vpop.f32.mrf.mxu3 }
  0xef   :  { %v760_v52 = vadd.f32 %v759_v46, %v2392_v32  ;;  %v786_v16 = vadd.f32 %v785_v51, %v2392_v32  ;;  %v710_v18 = vpop.f32.mrf.mxu0  ;;  %v736_v53 = vpop.f32.mrf.mxu1 }
  0xf0   :  { %v711_v54 = vadd.f32 %v710_v18, %v2436_v56  ;;  %v737_v55 = vadd.f32 %v736_v53, %v2436_v56 }
  0xf1   :  { %v796_v13 = vmax.f32 %v760_v52, 0.0  ;;  %v797_v62 = vmax.f32 %v786_v16, 0.0 }
  0xf2   :  { %v798_v63 = vmax.f32 %v711_v54, 0.0  ;;  %v799_v2 = vmax.f32 %v737_v55, 0.0 }
  0xf3   :  { %v808_v17 = vmax.f32 %v651_v49, %v796_v13  ;;  %v809_v59 = vmax.f32 %v652_v50, %v797_v62 }
  0xf4   :  { %v810_v60 = vmax.f32 %v653_v14, %v798_v63  ;;  %v811_v61 = vmax.f32 %v654_v15, %v799_v2 }
  0xf6   :  { %v762_v5 = vpop.f32.mrf.mxu2  ;;  %v788_v6 = vpop.f32.mrf.mxu3 }
  0xf7   :  { %v763_v47 = vadd.f32 %v762_v5, %v2436_v56  ;;  %v789_v48 = vadd.f32 %v788_v6, %v2436_v56  ;;  %v713_v8 = vpop.f32.mrf.mxu0  ;;  %v739_v9 = vpop.f32.mrf.mxu1 }
  0xf8   :  { %v714_v10 = vadd.f32 %v713_v8, %v2460_v7  ;;  %v740_v11 = vadd.f32 %v739_v9, %v2460_v7 }
  0xf9   :  { %v800_v30 = vmax.f32 %v763_v47, 0.0  ;;  %v801_v3 = vmax.f32 %v789_v48, 0.0 }
  0xfa   :  { %v802_v4 = vmax.f32 %v714_v10, 0.0  ;;  %v803_v57 = vmax.f32 %v740_v11, 0.0 }
  0xfb   :  { %v812_v49 = vmax.f32 %v655_v31, %v800_v30  ;;  %v813_v50 = vmax.f32 %v656_v22, %v801_v3 }
  0xfc   :  { %v814_v14 = vmax.f32 %v657_v33, %v802_v4  ;;  %v815_v15 = vmax.f32 %v658_v23, %v803_v57 }
  0xfe   :  { %v765_v24 = vpop.f32.mrf.mxu2  ;;  %v791_v58 = vpop.f32.mrf.mxu3 }
  0xff   :  { %v766_v0 = vadd.f32 %v765_v24, %v2460_v7  ;;  %v792_v21 = vadd.f32 %v791_v58, %v2460_v7  ;;  %v864_v1 = vpop.f32.mrf.mxu0  ;;  %v890_v25 = vpop.f32.mrf.mxu1 }
 0x100   :  { %v865_v26 = vadd.f32 %v864_v1, %v2392_v32  ;;  %v891_v29 = vadd.f32 %v890_v25, %v2392_v32 }
 0x101   :  { %v804_v43 = vmax.f32 %v766_v0, 0.0  ;;  %v805_v34 = vmax.f32 %v792_v21, 0.0 }
 0x102   :  { %v951_v19 = vmax.f32 %v865_v26, 0.0  ;;  %v952_v20 = vmax.f32 %v891_v29, 0.0 }
 0x103   :  { %v816_v31 = vmax.f32 %v659_v39, %v804_v43  ;;  %v817_v22 = vmax.f32 %v660_v40, %v805_v34 }
 0x104   :  { %v2606_v33 = vmax.f32 %v806_v41, %v951_v19  ;;  %v2608_v23 = vmax.f32 %v807_v42, %v952_v20 }
 0x106   :  { %v916_v35 = vpop.f32.mrf.mxu2  ;;  %v942_v36 = vpop.f32.mrf.mxu3 }
 0x107   :  { %v917_v27 = vadd.f32 %v916_v35, %v2392_v32  ;;  %v943_v37 = vadd.f32 %v942_v36, %v2392_v32  ;;  %v867_v28 = vpop.f32.mrf.mxu0  ;;  %v893_v38 = vpop.f32.mrf.mxu1 }
 0x108   :  { %v868_v12 = vadd.f32 %v867_v28, %v2436_v56  ;;  %v894_v44 = vadd.f32 %v893_v38, %v2436_v56 }
 0x109   :  { %v953_v45 = vmax.f32 %v917_v27, 0.0  ;;  %v954_v46 = vmax.f32 %v943_v37, 0.0 }
 0x10a   :  { %v955_v39 = vmax.f32 %v868_v12, 0.0  ;;  %v956_v40 = vmax.f32 %v894_v44, 0.0 }
 0x10b   :  { %v2614_v41 = vmax.f32 %v808_v17, %v953_v45  ;;  %v2616_v42 = vmax.f32 %v809_v59, %v954_v46 }
 0x10c   :  { %v2618_v51 = vmax.f32 %v810_v60, %v955_v39  ;;  %v2620_v52 = vmax.f32 %v811_v61, %v956_v40 }
 0x10e   :  { %v919_v16 = vpop.f32.mrf.mxu2  ;;  %v945_v18 = vpop.f32.mrf.mxu3 }
 0x10f   :  { %v920_v53 = vadd.f32 %v919_v16, %v2436_v56  ;;  %v946_v54 = vadd.f32 %v945_v18, %v2436_v56  ;;  %v870_v55 = vpop.f32.mrf.mxu0  ;;  %v896_v13 = vpop.f32.mrf.mxu1 }
 0x110   :  { %v871_v62 = vadd.f32 %v870_v55, %v2460_v7  ;;  %v897_v63 = vadd.f32 %v896_v13, %v2460_v7 }
 0x111   :  { %v957_v2 = vmax.f32 %v920_v53, 0.0  ;;  %v958_v17 = vmax.f32 %v946_v54, 0.0 }
 0x112   :  { %v959_v59 = vmax.f32 %v871_v62, 0.0  ;;  %v960_v5 = vmax.f32 %v897_v63, 0.0 }
 0x113   :  { %v2626_v60 = vmax.f32 %v812_v49, %v957_v2  ;;  %v2628_v61 = vmax.f32 %v813_v50, %v958_v17 }
 0x114   :  { %v2630_v6 = vmax.f32 %v814_v14, %v959_v59  ;;  %v2632_v47 = vmax.f32 %v815_v15, %v960_v5 }
 0x116   :  { %v922_v48 = vpop.f32.mrf.mxu2  ;;  %v948_v8 = vpop.f32.mrf.mxu3 }
 0x117   :  { %v923_v9 = vadd.f32 %v922_v48, %v2460_v7  ;;  %v949_v10 = vadd.f32 %v948_v8, %v2460_v7  ;;  %v1021_v11 = vpop.f32.mrf.mxu0  ;;  %v1047_v30 = vpop.f32.mrf.mxu1 }
 0x118   :  { %v1048_v35 = vadd.f32 %v1047_v30, %v2392_v32 }
 0x119   :  { %v961_v3 = vmax.f32 %v923_v9, 0.0  ;;  %v962_v4 = vmax.f32 %v949_v10, 0.0 }
 0x11a   :  { %v1109_v12 = vmax.f32 %v1048_v35, 0.0 }
 0x11b   :  { %v2636_v57 = vmax.f32 %v816_v31, %v961_v3  ;;  %v2638_v49 = vmax.f32 %v817_v22, %v962_v4  ;;  %v1022_v22 = vadd.f32 %v1021_v11, %v2392_v32 }
 0x11c   :  { %v1121_v53 = vmax.f32 %v2608_v23, %v1109_v12 }
 0x11d   :  { %v1108_v38 = vmax.f32 %v1022_v22, 0.0 }
 0x11e   :  { %v1073_v50 = vpop.f32.mrf.mxu2  ;;  %v1099_v24 = vpop.f32.mrf.mxu3 }
 0x11f   :  { %v1024_v14 = vpop.f32.mrf.mxu0  ;;  %v1050_v58 = vpop.f32.mrf.mxu1  ;;  %v1074_v44 = vadd.f32 %v1073_v50, %v2392_v32  ;;  %v1100_v45 = vadd.f32 %v1099_v24, %v2392_v32  ;;  %v1120_v18 = vmax.f32 %v2606_v33, %v1108_v38 }
 0x120   :  { %v1025_v40 = vadd.f32 %v1024_v14, %v2436_v56  ;;  %v1051_v16 = vadd.f32 %v1050_v58, %v2436_v56 }
 0x121   :  { %v1110_v54 = vmax.f32 %v1074_v44, 0.0  ;;  %v1111_v55 = vmax.f32 %v1100_v45, 0.0 }
 0x122   :  { %v1112_v17 = vmax.f32 %v1025_v40, 0.0  ;;  %v1113_v59 = vmax.f32 %v1051_v16, 0.0 }
 0x126   :  { %v1076_v15 = vpop.f32.mrf.mxu2  ;;  %v1102_v0 = vpop.f32.mrf.mxu3 }
 0x127   :  { %v1027_v21 = vpop.f32.mrf.mxu0  ;;  %v1053_v1 = vpop.f32.mrf.mxu1  ;;  %v1077_v33 = vadd.f32 %v1076_v15, %v2436_v56  ;;  %v1103_v23 = vadd.f32 %v1102_v0, %v2436_v56  ;;  %v1122_v0 = vmax.f32 %v2614_v41, %v1110_v54 }
 0x128   :  { %v1028_v30 = vadd.f32 %v1027_v21, %v2460_v7  ;;  %v1054_v3 = vadd.f32 %v1053_v1, %v2460_v7  ;;  %v1124_v21 = vmax.f32 %v2618_v51, %v1112_v17  ;;  %v1125_v1 = vmax.f32 %v2620_v52, %v1113_v59 }
 0x129   :  { %v1114_v38 = vmax.f32 %v1077_v33, 0.0 }
 0x12a   :  { %v1116_v12 = vmax.f32 %v1028_v30, 0.0  ;;  %v1117_v44 = vmax.f32 %v1054_v3, 0.0 }
 0x12e   :  { %v2640_v25 = vpop.f32.mrf.mxu2  ;;  %v2642_v26 = vpop.f32.mrf.mxu3 }
 0x12f   :  { %v1178_v29 = vpop.f32.mrf.mxu0  ;;  %v1204_v43 = vpop.f32.mrf.mxu1 }
 0x130   :  { %v1179_v46 = vadd.f32 %v1178_v29, %v2392_v32  ;;  %v1205_v39 = vadd.f32 %v1204_v43, %v2392_v32 }
 0x132   :  { %v1265_v13 = vmax.f32 %v1179_v46, 0.0  ;;  %v1266_v62 = vmax.f32 %v1205_v39, 0.0 }
 0x134   :  { %v1277_v24 = vmax.f32 %v1120_v18, %v1265_v13  ;;  %v1278_v14 = vmax.f32 %v1121_v53, %v1266_v62 }
 0x136   :  { %v1230_v34 = vpop.f32.mrf.mxu2  ;;  %v1256_v19 = vpop.f32.mrf.mxu3 }
 0x137   :  { %v1181_v20 = vpop.f32.mrf.mxu0  ;;  %v1207_v31 = vpop.f32.mrf.mxu1  ;;  %v1231_v5 = vadd.f32 %v1230_v34, %v2392_v32  ;;  %v1257_v48 = vadd.f32 %v1256_v19, %v2392_v32  ;;  %v1123_v34 = vmax.f32 %v2616_v42, %v1111_v55 }
 0x138   :  { %v1182_v4 = vadd.f32 %v1181_v20, %v2436_v56  ;;  %v1208_v50 = vadd.f32 %v1207_v31, %v2436_v56  ;;  %v1115_v31 = vmax.f32 %v1103_v23, 0.0 }
 0x139   :  { %v1267_v43 = vmax.f32 %v1231_v5, 0.0  ;;  %v1268_v15 = vmax.f32 %v1257_v48, 0.0 }
 0x13a   :  { %v1269_v35 = vmax.f32 %v1182_v4, 0.0  ;;  %v1270_v20 = vmax.f32 %v1208_v50, 0.0 }
 0x13b   :  { %v1279_v46 = vmax.f32 %v1122_v0, %v1267_v43  ;;  %v1280_v42 = vmax.f32 %v1123_v34, %v1268_v15 }
 0x13c   :  { %v1281_v55 = vmax.f32 %v1124_v21, %v1269_v35  ;;  %v1282_v13 = vmax.f32 %v1125_v1, %v1270_v20 }
 0x13e   :  { %v2646_v36 = vpop.f32.mrf.mxu2  ;;  %v2648_v27 = vpop.f32.mrf.mxu3 }
 0x13f   :  { %v2650_v37 = vpop.f32.mrf.mxu0  ;;  %v2652_v28 = vpop.f32.mrf.mxu1  ;;  %v1234_v16 = vadd.f32 %v2646_v36, %v2436_v56  ;;  %v1260_v18 = vadd.f32 %v2648_v27, %v2436_v56 }
 0x140   :  { %v1185_v59 = vadd.f32 %v2650_v37, %v2460_v7  ;;  %v1128_v37 = vmax.f32 %v2630_v6, %v1116_v12 }
 0x141   :  { %v1272_v27 = vmax.f32 %v1260_v18, 0.0 }
 0x142   :  { %v1273_v30 = vmax.f32 %v1185_v59, 0.0 }
 0x144   :  { %v1285_v34 = vmax.f32 %v1128_v37, %v1273_v30 }
 0x146   :  { %v2662_v63 = vpop.f32.mrf.mxu2  ;;  %v2664_v2 = vpop.f32.mrf.mxu3 }
 0x147   :  { %v1335_v8 = vpop.f32.mrf.mxu0  ;;  %v1361_v9 = vpop.f32.mrf.mxu1  ;;  %v1237_v43 = vadd.f32 %v2662_v63, %v2460_v7  ;;  %v1263_v15 = vadd.f32 %v2664_v2, %v2460_v7 }
 0x148   :  { %v1336_v10 = vadd.f32 %v1335_v8, %v2392_v32  ;;  %v1362_v11 = vadd.f32 %v1361_v9, %v2392_v32  ;;  %v1271_v9 = vmax.f32 %v1234_v16, 0.0 }
 0x14a   :  { %v1422_v58 = vmax.f32 %v1336_v10, 0.0  ;;  %v1423_v29 = vmax.f32 %v1362_v11, 0.0  ;;  %v1126_v10 = vmax.f32 %v2626_v60, %v1114_v38  ;;  %v1127_v11 = vmax.f32 %v2628_v61, %v1115_v31 }
 0x14b   :  { %v1080_v60 = vadd.f32 %v2640_v25, %v2460_v7  ;;  %v1106_v61 = vadd.f32 %v2642_v26, %v2460_v7 }
 0x14c   :  { %v1434_v19 = vmax.f32 %v1277_v24, %v1422_v58  ;;  %v1435_v22 = vmax.f32 %v1278_v14, %v1423_v29  ;;  %v1283_v58 = vmax.f32 %v1126_v10, %v1271_v9  ;;  %v1284_v29 = vmax.f32 %v1127_v11, %v1272_v27 }
 0x14d   :  { %v1118_v1 = vmax.f32 %v1080_v60, 0.0  ;;  %v1119_v35 = vmax.f32 %v1106_v61, 0.0 }
 0x14e   :  { %1446 = vst [vmem:[%s2751_s3] sm:$0xff] %v1434_v19  ;;  %v1387_v45 = vpop.f32.mrf.mxu2  ;;  %v1413_v41 = vpop.f32.mrf.mxu3 }
 0x14f   :  { %1447 = vst [vmem:[%s2751_s3 + $0x8] sm:$0xff] %v1435_v22  ;;  %v1388_v51 = vadd.f32 %v1387_v45, %v2392_v32  ;;  %v1414_v52 = vadd.f32 %v1413_v41, %v2392_v32  ;;  %v1338_v39 = vpop.f32.mrf.mxu0  ;;  %v1364_v40 = vpop.f32.mrf.mxu1  ;;  %v1211_v32 = vadd.f32 %v2652_v28, %v2460_v7  ;;  %v1129_v28 = vmax.f32 %v2632_v47, %v1117_v44 }
 0x150   :  { %v1339_v53 = vadd.f32 %v1338_v39, %v2436_v56  ;;  %v1365_v54 = vadd.f32 %v1364_v40, %v2436_v56  ;;  %v1275_v44 = vmax.f32 %v1237_v43, 0.0  ;;  %v1276_v45 = vmax.f32 %v1263_v15, 0.0 }
 0x151   :  { %v1424_v62 = vmax.f32 %v1388_v51, 0.0  ;;  %v1425_v17 = vmax.f32 %v1414_v52, 0.0  ;;  %v1274_v3 = vmax.f32 %v1211_v32, 0.0  ;;  %v1130_v41 = vmax.f32 %v2636_v57, %v1118_v1 }
 0x152   :  { %v1426_v5 = vmax.f32 %v1339_v53, 0.0  ;;  %v1427_v48 = vmax.f32 %v1365_v54, 0.0 }
 0x153   :  { %v1436_v36 = vmax.f32 %v1279_v46, %v1424_v62  ;;  %v1437_v8 = vmax.f32 %v1280_v42, %v1425_v17  ;;  %v1286_v19 = vmax.f32 %v1129_v28, %v1274_v3  ;;  %v1131_v46 = vmax.f32 %v2638_v49, %v1119_v35 }
 0x154   :  { %v1438_v33 = vmax.f32 %v1281_v55, %v1426_v5  ;;  %v1439_v23 = vmax.f32 %v1282_v13, %v1427_v48  ;;  %v1287_v52 = vmax.f32 %v1130_v41, %v1275_v44 }
 0x155   :  { %1448 = vst [vmem:[%s2751_s3 + $0x10] sm:$0xff] %v1436_v36  ;;  %v1288_v39 = vmax.f32 %v1131_v46, %v1276_v45 }
 0x156   :  { %1449 = vst [vmem:[%s2751_s3 + $0x18] sm:$0xff] %v1437_v8  ;;  %v1390_v4 = vpop.f32.mrf.mxu2  ;;  %v1416_v50 = vpop.f32.mrf.mxu3 }
 0x157   :  { %1450 = vst [vmem:[%s2751_s3 + $0x20] sm:$0xff] %v1438_v33  ;;  %v1391_v6 = vadd.f32 %v1390_v4, %v2436_v56  ;;  %v1417_v47 = vadd.f32 %v1416_v50, %v2436_v56  ;;  %v1341_v24 = vpop.f32.mrf.mxu0  ;;  %v1367_v14 = vpop.f32.mrf.mxu1 }
 0x158   :  { %1451 = vst [vmem:[%s2751_s3 + $0x28] sm:$0xff] %v1439_v23  ;;  %v1342_v25 = vadd.f32 %v1341_v24, %v2460_v7  ;;  %v1368_v26 = vadd.f32 %v1367_v14, %v2460_v7 }
 0x159   :  { %v1428_v0 = vmax.f32 %v1391_v6, 0.0  ;;  %v1429_v56 = vmax.f32 %v1417_v47, 0.0 }
 0x15a   :  { %v1430_v22 = vmax.f32 %v1342_v25, 0.0  ;;  %v1431_v21 = vmax.f32 %v1368_v26, 0.0 }
 0x15b   :  { %v1440_v20 = vmax.f32 %v1283_v58, %v1428_v0  ;;  %v1441_v38 = vmax.f32 %v1284_v29, %v1429_v56 }
 0x15c   :  { %v1442_v31 = vmax.f32 %v1285_v34, %v1430_v22  ;;  %v1443_v12 = vmax.f32 %v1286_v19, %v1431_v21 }
 0x15d   :  { %1452 = vst [vmem:[%s2751_s3 + $0x30] sm:$0xff] %v1440_v20 }
 0x15e   :  { %1453 = vst [vmem:[%s2751_s3 + $0x38] sm:$0xff] %v1441_v38  ;;  %v1393_v63 = vpop.f32.mrf.mxu2  ;;  %v1419_v2 = vpop.f32.mrf.mxu3 }
 0x15f   :  { %1454 = vst [vmem:[%s2751_s3 + $0x40] sm:$0xf] %v1442_v31  ;;  %v1394_v42 = vadd.f32 %v1393_v63, %v2460_v7  ;;  %v1420_v51 = vadd.f32 %v1419_v2, %v2460_v7 }
 0x160   :  { %1455 = vst [vmem:[%s2751_s3 + $0x48] sm:$0xf] %v1443_v12 }
 0x161   :  { %v1432_v40 = vmax.f32 %v1394_v42, 0.0  ;;  %v1433_v16 = vmax.f32 %v1420_v51, 0.0 }
 0x163   :  { %v1444_v18 = vmax.f32 %v1287_v52, %v1432_v40  ;;  %v1445_v57 = vmax.f32 %v1288_v39, %v1433_v16 }
 0x165   :  { %1456 = vst [vmem:[%s2751_s3 + $0x50] sm:$0xf] %v1444_v18 }
 0x166   :  { %1457 = vst [vmem:[%s2751_s3 + $0x58] sm:$0xf] %v1445_v57 }

</bundles_post_ra>
